<compile_context>
chip_gen: v7x
topology: tpu7x:2x2x1
jax: 0.10.0
libtpu: 0.0.40
codegen_flags: <defaults>
</compile_context>

<pallas_src>
import functools
import math

import jax
import jax.numpy as jnp
import numpy as np
from jax.experimental import pallas as pl
from jax.experimental.pallas import tpu as pltpu


# ---------------------------------------------------------------------------
# helpers (pure jnp: usable both inside kernels and in the reference)
# ---------------------------------------------------------------------------

def _layernorm(x, gamma, beta, eps):
    """LayerNorm over the last axis (biased variance, like nn.LayerNorm)."""
    mu = jnp.mean(x, axis=-1, keepdims=True)
    xc = x - mu
    var = jnp.mean(xc * xc, axis=-1, keepdims=True)
    return xc * jax.lax.rsqrt(var + eps) * gamma + beta


def _gelu_tanh(x):
    # TODO(synk): nn.GELU() defaults to the exact erf formulation; the tanh
    # approximation is used here (and in the in-script reference) because it
    # lowers to plain VPU/EUP ops on every TPU generation (max |diff| ~1e-3).
    c = math.sqrt(2.0 / math.pi)
    return 0.5 * x * (1.0 + jnp.tanh(c * (x + 0.044715 * x * x * x)))


# ---------------------------------------------------------------------------
# fused kernel: embedding LN -> n_layers encoder layers -> CLS head
# grid = (batch_blocks [parallel], n_layers [arbitrary])
# ---------------------------------------------------------------------------

def _bert_stack_kernel(tok_ref, seg_ref, pos_ref, ge_ref, be_ref, kpad_ref,
                       wqkv_ref, bqkv_ref, wo_ref, bo_ref,
                       gm_ref, bm_ref, g1_ref, b1_ref,
                       w1_ref, bf1_ref, w2_ref, bf2_ref, g2_ref, b2_ref,
                       wfc_ref, bfc_ref, gfc_ref, befc_ref, wcls_ref, bcls_ref,
                       logits_ref, x_acc,
                       *, n_heads, d_k, d_v, eps):
    layer = pl.program_id(1)
    n_layers = pl.num_programs(1)
    B_blk, L, D = tok_ref.shape
    H = n_heads
    M = B_blk * L
    cd = wqkv_ref.dtype                    # matmul-operand dtype (f32 or bf16)

    # --- layer 0: embedding sum + LayerNorm, fused into the stack ---
    @pl.when(layer == 0)
    def _():
        emb = tok_ref[...] + seg_ref[...] + pos_ref[...][None, :, :]
        x_acc[...] = _layernorm(emb.reshape(M, D), ge_ref[...], be_ref[...], eps)

    x2 = x_acc[...]                        # (M, D) f32, VMEM-resident hidden state
    x2c = x2.astype(cd)

    # --- fused QKV projection: one wide MXU matmul, M = B_blk * L ---
    qkv = jnp.dot(x2c, wqkv_ref[...],
                  preferred_element_type=jnp.float32) + bqkv_ref[...]
    q = qkv[:, :H * d_k]
    k = qkv[:, H * d_k:2 * H * d_k]
    v = qkv[:, 2 * H * d_k:]

    # One up-front relayout to a leading-batch (B_blk*H, L, d) head layout so both
    # attention contractions are plain batched dot_generals (no mid-dim head axis).
    q3 = q.reshape(B_blk, L, H, d_k).transpose(0, 2, 1, 3).reshape(B_blk * H, L, d_k).astype(cd)
    k3 = k.reshape(B_blk, L, H, d_k).transpose(0, 2, 1, 3).reshape(B_blk * H, L, d_k).astype(cd)
    v3 = v.reshape(B_blk, L, H, d_v).transpose(0, 2, 1, 3).reshape(B_blk * H, L, d_v).astype(cd)

    scale = 1.0 / math.sqrt(d_k)
    scores = jnp.einsum('bqd,bkd->bqk', q3, k3,
                        preferred_element_type=jnp.float32) * scale   # (B*H, Lq, Lk)

    # key-padding mask, applied in f32 AFTER the (possibly bf16) matmul.
    pad = kpad_ref[...] != 0                                          # (B_blk, 1, Lk)
    scores = scores.reshape(B_blk, H, L, L)
    scores = jnp.where(pad[:, :, None, :], jnp.float32(-1e9), scores)

    # softmax in f32; denominator via approximate reciprocal on the EUP.
    m = jnp.max(scores, axis=-1, keepdims=True)
    e = jnp.exp(scores - m)
    s = jnp.sum(e, axis=-1, keepdims=True)
    attn = e * pl.reciprocal(s, approx=True)                          # (B_blk, H, Lq, Lk)

    ctx = jnp.einsum('bqk,bkd->bqd',
                     attn.reshape(B_blk * H, L, L).astype(cd), v3,
                     preferred_element_type=jnp.float32)              # (B*H, Lq, d_v)
    ctx2 = ctx.reshape(B_blk, H, L, d_v).transpose(0, 2, 1, 3).reshape(M, H * d_v)

    # --- output projection + MHA's own LayerNorm + EncoderLayer.norm1 ---
    proj = jnp.dot(ctx2.astype(cd), wo_ref[...],
                   preferred_element_type=jnp.float32) + bo_ref[...]
    a = _layernorm(x2 + proj, gm_ref[...], bm_ref[...], eps)          # MHA.norm
    h = _layernorm(x2 + a, g1_ref[...], b1_ref[...], eps)             # norm1

    # --- feed-forward (GELU) + residual + norm2 ---
    f = jnp.dot(h.astype(cd), w1_ref[...],
                preferred_element_type=jnp.float32) + bf1_ref[...]
    f = _gelu_tanh(f)
    f = jnp.dot(f.astype(cd), w2_ref[...],
                preferred_element_type=jnp.float32) + bf2_ref[...]
    xo = _layernorm(h + f, g2_ref[...], b2_ref[...], eps)             # norm2

    x_acc[...] = xo                          # hidden state stays resident in VMEM

    # --- CLS head fused into the final layer iteration ---
    @pl.when(layer == n_layers - 1)
    def _():
        cls = xo.reshape(B_blk, L, D)[:, 0, :]                        # (B_blk, D)
        hh = jnp.dot(cls.astype(cd), wfc_ref[...],
                     preferred_element_type=jnp.float32) + bfc_ref[...]
        hh = _layernorm(jnp.tanh(hh), gfc_ref[...], befc_ref[...], eps)
        # TODO(synk): nn.Dropout(0.1) is the identity in eval/inference mode;
        # training-mode dropout is not implemented here.
        logits = jnp.dot(hh.astype(cd), wcls_ref[...],
                         preferred_element_type=jnp.float32) + bcls_ref[...]
        logits_ref[...] = logits[:, None, :]                          # (B_blk, 1, C)


# ---------------------------------------------------------------------------
# one-time parameter packing (layer stacking, fused QKV, optional bf16 weights)
# ---------------------------------------------------------------------------

def pack_bert_params(params, *, compute_dtype=jnp.float32):
    """Pack parameters ONCE for the fused kernel.

    Generation guidance: on v6e/v7x pass compute_dtype=jnp.bfloat16 (fast MXU
    path + half the weight HBM bytes).  On v5e keep f32 operands unless the
    layer is weight-bandwidth bound.  Biases / LayerNorm params stay f32."""
    emb_params, layer_params, head_params = params
    tok_e, pos_e, seg_e, g_emb, b_emb = emb_params
    w_fc, b_fc, g_fc, be_fc, w_cls, b_cls = head_params

    row = lambda a: a.reshape(1, -1).astype(jnp.float32)
    stack_w = lambda xs: jnp.stack(xs).astype(compute_dtype)
    stack_row = lambda xs: jnp.stack([row(x) for x in xs])

    wqkv, bqkv, wo, bo, gm, bm, g1, b1, w1, bf1, w2, bf2, g2, b2 = \
        ([] for _ in range(14))
    for (q_w, q_b, k_w, k_b, v_w, v_b, o_w, o_b,
         gm_, bm_, g1_, b1_, f1_w, f1_b, f2_w, f2_b, g2_, b2_) in layer_params:
        wqkv.append(jnp.concatenate([q_w, k_w, v_w], axis=1))
        bqkv.append(jnp.concatenate([q_b, k_b, v_b]))
        wo.append(o_w); bo.append(o_b)
        gm.append(gm_); bm.append(bm_); g1.append(g1_); b1.append(b1_)
        w1.append(f1_w); bf1.append(f1_b); w2.append(f2_w); bf2.append(f2_b)
        g2.append(g2_); b2.append(b2_)

    return dict(
        tok_e=tok_e, pos_e=pos_e, seg_e=seg_e, g_emb=row(g_emb), b_emb=row(b_emb),
        w_qkv=stack_w(wqkv), b_qkv=stack_row(bqkv),
        w_o=stack_w(wo), b_o=stack_row(bo),
        g_mha=stack_row(gm), b_mha=stack_row(bm),
        g_n1=stack_row(g1), b_n1=stack_row(b1),
        w_ff1=stack_w(w1), b_ff1=stack_row(bf1),
        w_ff2=stack_w(w2), b_ff2=stack_row(bf2),
        g_n2=stack_row(g2), b_n2=stack_row(b2),
        w_fc=w_fc.astype(compute_dtype), b_fc=row(b_fc),
        g_fc=row(g_fc), be_fc=row(be_fc),
        w_cls=w_cls.astype(compute_dtype), b_cls=row(b_cls),
    )


_LAYER_KEYS = ('w_qkv', 'b_qkv', 'w_o', 'b_o', 'g_mha', 'b_mha', 'g_n1', 'b_n1',
               'w_ff1', 'b_ff1', 'w_ff2', 'b_ff2', 'g_n2', 'b_n2')
_HEAD_KEYS = ('w_fc', 'b_fc', 'g_fc', 'be_fc', 'w_cls', 'b_cls')


def _choose_b_blk(B, L, D, d_ff, H, d_k, d_v, act_budget_bytes=24 * 1024 * 1024):
    """Largest divisor of B whose f32 activation working set fits the budget,
    while keeping >= 2 batch blocks (pipelining + v7x 2-TC sharding)."""
    w_qkv = 2 * H * d_k + H * d_v
    per_b = 4 * L * (8 * D + w_qkv + H * d_v + 3 * H * L + d_ff)
    b = max(1, min(B, act_budget_bytes // max(per_b, 1)))
    while b > 1 and B // b < 2:
        b -= 1
    while B % b:
        b -= 1
    return max(b, 1)


def _vmem_limit_bytes(packed, b_blk, L, D, H, d_k, d_v, d_ff, n_layers, n_cls):
    """vmem limit from actual buffer sizes (with headroom), capped at 3/4 of
    the chip's physical per-core VMEM."""
    nbytes = lambda a: int(a.size) * a.dtype.itemsize
    per_layer = sum(nbytes(packed[k]) for k in _LAYER_KEYS) // max(n_layers, 1)
    const = sum(nbytes(packed[k]) for k in
                ('g_emb', 'b_emb') + _HEAD_KEYS) + L * D * 4        # + pos block
    blk_io = b_blk * (2 * L * D * 4 + L * 4 + n_cls * 4)           # tok/seg/pad/logits
    scratch = b_blk * L * D * 4
    act = b_blk * 4 * L * (8 * D + (2 * H * d_k + H * d_v) + H * d_v + 3 * H * L + d_ff)
    need = 2 * (per_layer + blk_io + const) + scratch + act
    try:
        cap = pltpu.get_tpu_info().vmem_capacity_bytes
    except Exception:
        cap = 64 * 1024 * 1024                                     # v7x per-core size
    return int(min(cap * 3 // 4, max(2 * need, 32 * 1024 * 1024)))


# ---------------------------------------------------------------------------
# full forward
# ---------------------------------------------------------------------------

def bert_classifier_forward(input_ids, segment_ids, packed, *, n_heads, d_k, d_v,
                            b_blk=None, eps=1e-5):
    B, L = input_ids.shape
    D = packed['tok_e'].shape[1]
    n_layers = packed['w_qkv'].shape[0]
    d_ff = packed['w_ff1'].shape[-1]
    C = packed['w_cls'].shape[-1]
    H = n_heads

    # TODO(synk): embedding-table gathers are data-dependent lookups; they are
    # done with jnp.take outside the kernel (a manual DMA gather adds no value
    # at these table sizes).
    tok_g = jnp.take(packed['tok_e'], input_ids, axis=0)        # (B, L, D)
    seg_g = jnp.take(packed['seg_e'], segment_ids, axis=0)      # (B, L, D)
    pos = packed['pos_e'][:L]                                   # (L, D), reused per block
    kpad = (input_ids == 0).astype(jnp.int32)[:, None, :]       # (B, 1, L)

    if b_blk is None:
        b_blk = _choose_b_blk(B, L, D, d_ff, H, d_k, d_v)
    assert B % b_blk == 0

    batched3 = lambda shape: pl.BlockSpec(shape, lambda i, l: (i, 0, 0))
    const = lambda a: pl.BlockSpec(a.shape, lambda i, l, n=a.ndim: (0,) * n)
    per_layer = lambda a: pl.BlockSpec(
        (None,) + tuple(a.shape[1:]),
        lambda i, l, n=a.ndim: (l,) + (0,) * (n - 1))

    layer_args = tuple(packed[k] for k in _LAYER_KEYS)
    head_args = tuple(packed[k] for k in _HEAD_KEYS)

    in_specs = ([batched3((b_blk, L, D)),                   # tok gather block
                 batched3((b_blk, L, D)),                   # seg gather block
                 const(pos),                                 # positional (L, D)
                 const(packed['g_emb']), const(packed['b_emb']),
                 batched3((b_blk, 1, L))]                    # key-padding mask
                + [per_layer(a) for a in layer_args]         # layer-stacked weights
                + [const(a) for a in head_args])             # CLS head weights

    kernel = functools.partial(_bert_stack_kernel,
                               n_heads=H, d_k=d_k, d_v=d_v, eps=eps)

    logits = pl.pallas_call(
        kernel,
        out_shape=jax.ShapeDtypeStruct((B, 1, C), jnp.float32),
        grid_spec=pltpu.PrefetchScalarGridSpec(
            num_scalar_prefetch=0,
            grid=(B // b_blk, n_layers),
            in_specs=in_specs,
            out_specs=pl.BlockSpec((b_blk, 1, C), lambda i, l: (i, 0, 0)),
            scratch_shapes=[pltpu.VMEM((b_blk * L, D), jnp.float32)],
        ),
        compiler_params=pltpu.CompilerParams(
            dimension_semantics=("parallel", "arbitrary"),
            vmem_limit_bytes=_vmem_limit_bytes(packed, b_blk, L, D, H, d_k, d_v,
                                               d_ff, n_layers, C),
        ),
    )(tok_g, seg_g, pos, packed['g_emb'], packed['b_emb'], kpad,
      *layer_args, *head_args)

    return logits[:, 0, :]                                   # (B, C)


# ---------------------------------------------------------------------------
# pure-JAX reference mirroring the PyTorch module
# ---------------------------------------------------------------------------

def reference_forward(input_ids, segment_ids, params, *, n_heads, d_k, d_v,
                      eps=1e-5):
    emb_params, layer_params, head_params = params
    tok_e, pos_e, seg_e, g_emb, b_emb = emb_params
    B, L = input_ids.shape
    H = n_heads

    x = tok_e[input_ids] + pos_e[jnp.arange(L)][None, :, :] + seg_e[segment_ids]
    x = _layernorm(x, g_emb, b_emb, eps)

    pad = (input_ids == 0)[:, None, None, :]                    # (B,1,1,Lk)

    for (wq, bq, wk, bk, wv, bv, wo, bo, gm, bm, g1, b1,
         w1, bf1, w2, bf2, g2, b2) in layer_params:
        q = (x @ wq + bq).reshape(B, L, H, d_k).transpose(0, 2, 1, 3)
        k = (x @ wk + bk).reshape(B, L, H, d_k).transpose(0, 2, 1, 3)
        v = (x @ wv + bv).reshape(B, L, H, d_v).transpose(0, 2, 1, 3)
        scores = jnp.einsum('bhqd,bhkd->bhqk', q, k) / math.sqrt(d_k)
        scores = jnp.where(pad, -1e9, scores)
        attn = jax.nn.softmax(scores, axis=-1)
        ctx = jnp.einsum('bhqk,bhkv->bqhv', attn, v).reshape(B, L, H * d_v)
        a = _layernorm(x + ctx @ wo + bo, gm, bm, eps)           # MHA.norm
        x = _layernorm(x + a, g1, b1, eps)                       # norm1
        f = _gelu_tanh(x @ w1 + bf1) @ w2 + bf2
        x = _layernorm(x + f, g2, b2, eps)                       # norm2

    w_fc, b_fc, g_fc, be_fc, w_cls, b_cls = head_params
    h = jnp.tanh(x[:, 0] @ w_fc + b_fc)
    h = _layernorm(h, g_fc, be_fc, eps)
    return h @ w_cls + b_cls


# ---------------------------------------------------------------------------
# demo / self-test
# ---------------------------------------------------------------------------

if __name__ == "__main__":
    vocab_size, maxlen, n_segments = 40, 16, 2
    d_model, n_layers, n_heads, d_k, d_v, d_ff = 32, 2, 4, 8, 8, 64
    num_classes = 2
    B, L = 2, 8

    keys = iter(jax.random.split(jax.random.PRNGKey(0), 256))
    nk = lambda: next(keys)

    def lin_init(fan_in, fan_out):
        bound = 1.0 / math.sqrt(fan_in)
        w = jax.random.uniform(nk(), (fan_in, fan_out), jnp.float32, -bound, bound)
        b = jax.random.uniform(nk(), (fan_out,), jnp.float32, -bound, bound)
        return w, b

    tok_e = jax.random.normal(nk(), (vocab_size, d_model), jnp.float32)
    tok_e = tok_e.at[0].set(0.0)                    # padding_idx=0
    pos_e = jax.random.normal(nk(), (maxlen, d_model), jnp.float32)
    seg_e = jax.random.normal(nk(), (n_segments, d_model), jnp.float32)
    ones = jnp.ones((d_model,), jnp.float32)
    zeros = jnp.zeros((d_model,), jnp.float32)
    emb_params = (tok_e, pos_e, seg_e, ones, zeros)

    layer_params = []
    for _ in range(n_layers):
        wq, bq = lin_init(d_model, n_heads * d_k)
        wk, bk = lin_init(d_model, n_heads * d_k)
        wv, bv = lin_init(d_model, n_heads * d_v)
        wo, bo = lin_init(n_heads * d_v, d_model)
        w1, bf1 = lin_init(d_model, d_ff)
        w2, bf2 = lin_init(d_ff, d_model)
        layer_params.append((wq, bq, wk, bk, wv, bv, wo, bo,
                             ones, zeros, ones, zeros,
                             w1, bf1, w2, bf2, ones, zeros))

    w_fc, b_fc = lin_init(d_model, d_model)
    w_cls, b_cls = lin_init(d_model, num_classes)
    head_params = (w_fc, b_fc, ones, zeros, w_cls, b_cls)

    params = (emb_params, tuple(layer_params), head_params)

    input_ids = jax.random.randint(nk(), (B, L), 1, vocab_size)
    input_ids = input_ids.at[:, -2:].set(0)         # pad the last two positions
    segment_ids = jnp.tile((jnp.arange(L) >= L // 2).astype(jnp.int32)[None, :],
                           (B, 1))

    ref_logits = reference_forward(input_ids, segment_ids, params,
                                   n_heads=n_heads, d_k=d_k, d_v=d_v)

    # f32 matmul-operand path (only approx softmax reciprocal differs)
    packed_f32 = pack_bert_params(params, compute_dtype=jnp.float32)
    logits = bert_classifier_forward(input_ids, segment_ids, packed_f32,
                                     n_heads=n_heads, d_k=d_k, d_v=d_v)
    jax.block_until_ready(logits)
    np.testing.assert_allclose(np.asarray(logits), np.asarray(ref_logits),
                               rtol=1e-2, atol=5e-3)

    # bf16 matmul-operand path (v6e/v7x MXU); stats / LN / softmax stay in f32.
    packed_bf16 = pack_bert_params(params, compute_dtype=jnp.bfloat16)
    logits_bf16 = bert_classifier_forward(input_ids, segment_ids, packed_bf16,
                                          n_heads=n_heads, d_k=d_k, d_v=d_v)
    jax.block_until_ready(logits_bf16)
    np.testing.assert_allclose(np.asarray(logits_bf16), np.asarray(ref_logits),
                               rtol=2e-1, atol=2e-1)

    print("KERNEL_OK")
</pallas_src>

<mosaic_0001>
module attributes {stable_mosaic.version = 11 : i64} {
  func.func @_bert_stack_kernel(%arg0: i32, %arg1: i32, %arg2: memref<1x8x32xf32, #tpu.memory_space<vmem>>, %arg3: memref<1x8x32xf32, #tpu.memory_space<vmem>>, %arg4: memref<8x32xf32, #tpu.memory_space<vmem>>, %arg5: memref<1x32xf32, #tpu.memory_space<vmem>>, %arg6: memref<1x32xf32, #tpu.memory_space<vmem>>, %arg7: memref<1x1x8xi32, #tpu.memory_space<vmem>>, %arg8: memref<1x32x96xf32, #tpu.memory_space<vmem>>, %arg9: memref<1x1x96xf32, #tpu.memory_space<vmem>>, %arg10: memref<1x32x32xf32, #tpu.memory_space<vmem>>, %arg11: memref<1x1x32xf32, #tpu.memory_space<vmem>>, %arg12: memref<1x1x32xf32, #tpu.memory_space<vmem>>, %arg13: memref<1x1x32xf32, #tpu.memory_space<vmem>>, %arg14: memref<1x1x32xf32, #tpu.memory_space<vmem>>, %arg15: memref<1x1x32xf32, #tpu.memory_space<vmem>>, %arg16: memref<1x32x64xf32, #tpu.memory_space<vmem>>, %arg17: memref<1x1x64xf32, #tpu.memory_space<vmem>>, %arg18: memref<1x64x32xf32, #tpu.memory_space<vmem>>, %arg19: memref<1x1x32xf32, #tpu.memory_space<vmem>>, %arg20: memref<1x1x32xf32, #tpu.memory_space<vmem>>, %arg21: memref<1x1x32xf32, #tpu.memory_space<vmem>>, %arg22: memref<32x32xf32, #tpu.memory_space<vmem>>, %arg23: memref<1x32xf32, #tpu.memory_space<vmem>>, %arg24: memref<1x32xf32, #tpu.memory_space<vmem>>, %arg25: memref<1x32xf32, #tpu.memory_space<vmem>>, %arg26: memref<32x2xf32, #tpu.memory_space<vmem>>, %arg27: memref<1x2xf32, #tpu.memory_space<vmem>>, %arg28: memref<1x1x2xf32, #tpu.memory_space<vmem>>, %arg29: memref<8x32xf32, #tpu.memory_space<vmem>>) attributes {dimension_semantics = [#tpu.dimension_semantics<parallel>, #tpu.dimension_semantics<arbitrary>], iteration_bounds = array<i64: 2, 2>, scalar_prefetch = 0 : i64, scratch_operands = 1 : i64, tpu.core_type = #tpu.core_type<tc>, window_params = [{transform_indices = @transform_0, window_bounds = array<i64: 1, 8, 32>}, {transform_indices = @transform_1, window_bounds = array<i64: 1, 8, 32>}, {pipeline_mode = #tpu.pipeline_mode<synchronous>, transform_indices = @transform_2, window_bounds = array<i64: 8, 32>}, {pipeline_mode = #tpu.pipeline_mode<synchronous>, transform_indices = @transform_3, window_bounds = array<i64: 1, 32>}, {pipeline_mode = #tpu.pipeline_mode<synchronous>, transform_indices = @transform_4, window_bounds = array<i64: 1, 32>}, {transform_indices = @transform_5, window_bounds = array<i64: 1, 1, 8>}, {transform_indices = @transform_6, window_bounds = array<i64: 1, 32, 96>}, {transform_indices = @transform_7, window_bounds = array<i64: 1, 1, 96>}, {transform_indices = @transform_8, window_bounds = array<i64: 1, 32, 32>}, {transform_indices = @transform_9, window_bounds = array<i64: 1, 1, 32>}, {transform_indices = @transform_10, window_bounds = array<i64: 1, 1, 32>}, {transform_indices = @transform_11, window_bounds = array<i64: 1, 1, 32>}, {transform_indices = @transform_12, window_bounds = array<i64: 1, 1, 32>}, {transform_indices = @transform_13, window_bounds = array<i64: 1, 1, 32>}, {transform_indices = @transform_14, window_bounds = array<i64: 1, 32, 64>}, {transform_indices = @transform_15, window_bounds = array<i64: 1, 1, 64>}, {transform_indices = @transform_16, window_bounds = array<i64: 1, 64, 32>}, {transform_indices = @transform_17, window_bounds = array<i64: 1, 1, 32>}, {transform_indices = @transform_18, window_bounds = array<i64: 1, 1, 32>}, {transform_indices = @transform_19, window_bounds = array<i64: 1, 1, 32>}, {pipeline_mode = #tpu.pipeline_mode<synchronous>, transform_indices = @transform_20, window_bounds = array<i64: 32, 32>}, {pipeline_mode = #tpu.pipeline_mode<synchronous>, transform_indices = @transform_21, window_bounds = array<i64: 1, 32>}, {pipeline_mode = #tpu.pipeline_mode<synchronous>, transform_indices = @transform_22, window_bounds = array<i64: 1, 32>}, {pipeline_mode = #tpu.pipeline_mode<synchronous>, transform_indices = @transform_23, window_bounds = array<i64: 1, 32>}, {pipeline_mode = #tpu.pipeline_mode<synchronous>, transform_indices = @transform_24, window_bounds = array<i64: 32, 2>}, {pipeline_mode = #tpu.pipeline_mode<synchronous>, transform_indices = @transform_25, window_bounds = array<i64: 1, 2>}, {transform_indices = @transform_26, window_bounds = array<i64: 1, 1, 2>}]} {
    %c0_i32 = arith.constant 0 : i32
    %0 = arith.cmpi eq, %arg1, %c0_i32 : i32
    %1 = arith.extui %0 : i1 to i32
    %c0_i32_0 = arith.constant 0 : i32
    %2 = arith.cmpi ne, %1, %c0_i32_0 : i32
    scf.if %2 {
      %c0_79 = arith.constant 0 : index
      %c0_80 = arith.constant 0 : index
      %c0_81 = arith.constant 0 : index
      %163 = vector.load %arg2[%c0_79, %c0_80, %c0_81] : memref<1x8x32xf32, #tpu.memory_space<vmem>>, vector<1x8x32xf32>
      %c0_82 = arith.constant 0 : index
      %c0_83 = arith.constant 0 : index
      %c0_84 = arith.constant 0 : index
      %164 = vector.load %arg3[%c0_82, %c0_83, %c0_84] : memref<1x8x32xf32, #tpu.memory_space<vmem>>, vector<1x8x32xf32>
      %165 = arith.addf %163, %164 : vector<1x8x32xf32>
      %c0_85 = arith.constant 0 : index
      %c0_86 = arith.constant 0 : index
      %166 = vector.load %arg4[%c0_85, %c0_86] : memref<8x32xf32, #tpu.memory_space<vmem>>, vector<8x32xf32>
      %167 = vector.shape_cast %166 : vector<8x32xf32> to vector<1x8x32xf32>
      %168 = arith.addf %165, %167 : vector<1x8x32xf32>
      %169 = vector.shape_cast %168 : vector<1x8x32xf32> to vector<8x32xf32>
      %c0_87 = arith.constant 0 : index
      %c0_88 = arith.constant 0 : index
      %170 = vector.load %arg5[%c0_87, %c0_88] : memref<1x32xf32, #tpu.memory_space<vmem>>, vector<1x32xf32>
      %c0_89 = arith.constant 0 : index
      %c0_90 = arith.constant 0 : index
      %171 = vector.load %arg6[%c0_89, %c0_90] : memref<1x32xf32, #tpu.memory_space<vmem>>, vector<1x32xf32>
      %cst_91 = arith.constant dense<0.000000e+00> : vector<8xf32>
      %172 = vector.multi_reduction <add>, %169, %cst_91 [1] : vector<8x32xf32> to vector<8xf32>
      %173 = vector.shape_cast %172 : vector<8xf32> to vector<8x1xf32>
      %cst_92 = arith.constant 3.200000e+01 : f32
      %174 = vector.broadcast %cst_92 : f32 to vector<8x1xf32>
      %175 = arith.divf %173, %174 : vector<8x1xf32>
      %176 = vector.broadcast %175 : vector<8x1xf32> to vector<8x32xf32>
      %177 = arith.subf %169, %176 : vector<8x32xf32>
      %178 = arith.mulf %177, %177 : vector<8x32xf32>
      %cst_93 = arith.constant dense<0.000000e+00> : vector<8xf32>
      %179 = vector.multi_reduction <add>, %178, %cst_93 [1] : vector<8x32xf32> to vector<8xf32>
      %180 = vector.shape_cast %179 : vector<8xf32> to vector<8x1xf32>
      %cst_94 = arith.constant 3.200000e+01 : f32
      %181 = vector.broadcast %cst_94 : f32 to vector<8x1xf32>
      %182 = arith.divf %180, %181 : vector<8x1xf32>
      %cst_95 = arith.constant 9.99999974E-6 : f32
      %183 = vector.broadcast %cst_95 : f32 to vector<8x1xf32>
      %184 = arith.addf %182, %183 : vector<8x1xf32>
      %185 = math.rsqrt %184 : vector<8x1xf32>
      %186 = vector.broadcast %185 : vector<8x1xf32> to vector<8x32xf32>
      %187 = arith.mulf %177, %186 : vector<8x32xf32>
      %188 = vector.broadcast %170 : vector<1x32xf32> to vector<8x32xf32>
      %189 = arith.mulf %187, %188 : vector<8x32xf32>
      %190 = vector.broadcast %171 : vector<1x32xf32> to vector<8x32xf32>
      %191 = arith.addf %189, %190 : vector<8x32xf32>
      %c0_96 = arith.constant 0 : index
      %c0_97 = arith.constant 0 : index
      %192 = vector.load %arg29[%c0_96, %c0_97] : memref<8x32xf32, #tpu.memory_space<vmem>>, vector<8x32xf32>
      tpu.vector_store %arg29[%c0_96, %c0_97], %191 {strides = array<i32>} : memref<8x32xf32, #tpu.memory_space<vmem>>, vector<8x32xf32>,
    } else {
    }
    %c0 = arith.constant 0 : index
    %c0_1 = arith.constant 0 : index
    %3 = vector.load %arg29[%c0, %c0_1] : memref<8x32xf32, #tpu.memory_space<vmem>>, vector<8x32xf32>
    %c0_2 = arith.constant 0 : index
    %c0_3 = arith.constant 0 : index
    %c0_4 = arith.constant 0 : index
    %4 = vector.load %arg8[%c0_2, %c0_3, %c0_4] : memref<1x32x96xf32, #tpu.memory_space<vmem>>, vector<1x32x96xf32>
    %5 = vector.shape_cast %4 : vector<1x32x96xf32> to vector<32x96xf32>
    %cst = arith.constant dense<0.000000e+00> : vector<8x96xf32>
    %6 = tpu.matmul %3, %5, %cst {dimension_numbers = #tpu.dot_dimension_numbers<[1], [0], [0], [1], [0, 0, 1, 1], [], []>} : vector<8x32xf32>, vector<32x96xf32>, vector<8x96xf32> -> vector<8x96xf32>
    %c0_5 = arith.constant 0 : index
    %c0_6 = arith.constant 0 : index
    %c0_7 = arith.constant 0 : index
    %7 = vector.load %arg9[%c0_5, %c0_6, %c0_7] : memref<1x1x96xf32, #tpu.memory_space<vmem>>, vector<1x1x96xf32>
    %8 = vector.shape_cast %7 : vector<1x1x96xf32> to vector<1x96xf32>
    %9 = vector.broadcast %8 : vector<1x96xf32> to vector<8x96xf32>
    %10 = arith.addf %6, %9 : vector<8x96xf32>
    %11 = vector.extract_strided_slice %10 {offsets = [0, 0], sizes = [8, 32], strides = [1, 1]} : vector<8x96xf32> to vector<8x32xf32>
    %12 = vector.extract_strided_slice %10 {offsets = [0, 32], sizes = [8, 32], strides = [1, 1]} : vector<8x96xf32> to vector<8x32xf32>
    %13 = vector.extract_strided_slice %10 {offsets = [0, 64], sizes = [8, 32], strides = [1, 1]} : vector<8x96xf32> to vector<8x32xf32>
    %14 = vector.shape_cast %11 : vector<8x32xf32> to vector<1x8x4x8xf32>
    %15 = tpu.transpose %14, [0, 2, 1, 3] : vector<1x8x4x8xf32> -> vector<1x4x8x8xf32>
    %16 = vector.shape_cast %15 : vector<1x4x8x8xf32> to vector<4x8x8xf32>
    %17 = vector.shape_cast %12 : vector<8x32xf32> to vector<1x8x4x8xf32>
    %18 = tpu.transpose %17, [0, 2, 1, 3] : vector<1x8x4x8xf32> -> vector<1x4x8x8xf32>
    %19 = vector.shape_cast %18 : vector<1x4x8x8xf32> to vector<4x8x8xf32>
    %20 = vector.shape_cast %13 : vector<8x32xf32> to vector<1x8x4x8xf32>
    %21 = tpu.transpose %20, [0, 2, 1, 3] : vector<1x8x4x8xf32> -> vector<1x4x8x8xf32>
    %22 = vector.shape_cast %21 : vector<1x4x8x8xf32> to vector<4x8x8xf32>
    "tpu.trace_start"() <{level = 10 : i32, message = "bqd,bkd->bqk"}> : () -> ()
    %cst_8 = arith.constant dense<0.000000e+00> : vector<4x8x8xf32>
    %23 = tpu.matmul %16, %19, %cst_8 {dimension_numbers = #tpu.dot_dimension_numbers<[2], [2], [1], [1], [0, 0, 0, 1, 1, 1], [0], [0]>} : vector<4x8x8xf32>, vector<4x8x8xf32>, vector<4x8x8xf32> -> vector<4x8x8xf32>
    "tpu.trace_stop"() : () -> ()
    %cst_9 = arith.constant 0.353553385 : f32
    %24 = vector.broadcast %cst_9 : f32 to vector<4x8x8xf32>
    %25 = arith.mulf %23, %24 : vector<4x8x8xf32>
    %c0_10 = arith.constant 0 : index
    %c0_11 = arith.constant 0 : index
    %c0_12 = arith.constant 0 : index
    %26 = vector.load %arg7[%c0_10, %c0_11, %c0_12] : memref<1x1x8xi32, #tpu.memory_space<vmem>>, vector<1x1x8xi32>
    %c0_i32_13 = arith.constant 0 : i32
    %27 = vector.broadcast %c0_i32_13 : i32 to vector<1x1x8xi32>
    %28 = arith.cmpi ne, %26, %27 : vector<1x1x8xi32>
    %29 = vector.shape_cast %25 : vector<4x8x8xf32> to vector<1x4x8x8xf32>
    %30 = vector.shape_cast %28 : vector<1x1x8xi1> to vector<1x1x1x8xi1>
    %cst_14 = arith.constant -1.000000e+09 : f32
    %31 = vector.shape_cast %30 : vector<1x1x1x8xi1> to vector<1x1x1x8xi1>
    %32 = vector.broadcast %31 : vector<1x1x1x8xi1> to vector<1x4x8x8xi1>
    %33 = vector.broadcast %cst_14 : f32 to vector<1x4x8x8xf32>
    %34 = arith.select %32, %33, %29 : vector<1x4x8x8xi1>, vector<1x4x8x8xf32>
    %cst_15 = arith.constant dense<0xFF800000> : vector<1x4x8xf32>
    %35 = vector.multi_reduction <maximumf>, %34, %cst_15 [3] : vector<1x4x8x8xf32> to vector<1x4x8xf32>
    %36 = vector.shape_cast %35 : vector<1x4x8xf32> to vector<1x4x8x1xf32>
    %37 = vector.broadcast %36 : vector<1x4x8x1xf32> to vector<1x4x8x8xf32>
    %38 = arith.subf %34, %37 : vector<1x4x8x8xf32>
    %39 = math.exp %38 : vector<1x4x8x8xf32>
    %cst_16 = arith.constant dense<0.000000e+00> : vector<1x4x8xf32>
    %40 = vector.multi_reduction <add>, %39, %cst_16 [3] : vector<1x4x8x8xf32> to vector<1x4x8xf32>
    %41 = vector.shape_cast %40 : vector<1x4x8xf32> to vector<1x4x8x1xf32>
    %42 = tpu.reciprocal %41 {approx = true} : vector<1x4x8x1xf32> -> vector<1x4x8x1xf32>
    %43 = vector.broadcast %42 : vector<1x4x8x1xf32> to vector<1x4x8x8xf32>
    %44 = arith.mulf %39, %43 : vector<1x4x8x8xf32>
    %45 = vector.shape_cast %44 : vector<1x4x8x8xf32> to vector<4x8x8xf32>
    "tpu.trace_start"() <{level = 10 : i32, message = "bqk,bkd->bqd"}> : () -> ()
    %cst_17 = arith.constant dense<0.000000e+00> : vector<4x8x8xf32>
    %46 = tpu.matmul %45, %22, %cst_17 {dimension_numbers = #tpu.dot_dimension_numbers<[2], [1], [1], [2], [0, 0, 0, 1, 1, 2], [0], [0]>} : vector<4x8x8xf32>, vector<4x8x8xf32>, vector<4x8x8xf32> -> vector<4x8x8xf32>
    "tpu.trace_stop"() : () -> ()
    %47 = vector.shape_cast %46 : vector<4x8x8xf32> to vector<1x4x8x8xf32>
    %48 = tpu.transpose %47, [0, 2, 1, 3] : vector<1x4x8x8xf32> -> vector<1x8x4x8xf32>
    %49 = vector.shape_cast %48 : vector<1x8x4x8xf32> to vector<8x32xf32>
    %c0_18 = arith.constant 0 : index
    %c0_19 = arith.constant 0 : index
    %c0_20 = arith.constant 0 : index
    %50 = vector.load %arg10[%c0_18, %c0_19, %c0_20] : memref<1x32x32xf32, #tpu.memory_space<vmem>>, vector<1x32x32xf32>
    %51 = vector.shape_cast %50 : vector<1x32x32xf32> to vector<32x32xf32>
    %cst_21 = arith.constant dense<0.000000e+00> : vector<8x32xf32>
    %52 = tpu.matmul %49, %51, %cst_21 {dimension_numbers = #tpu.dot_dimension_numbers<[1], [0], [0], [1], [0, 0, 1, 1], [], []>} : vector<8x32xf32>, vector<32x32xf32>, vector<8x32xf32> -> vector<8x32xf32>
    %c0_22 = arith.constant 0 : index
    %c0_23 = arith.constant 0 : index
    %c0_24 = arith.constant 0 : index
    %53 = vector.load %arg11[%c0_22, %c0_23, %c0_24] : memref<1x1x32xf32, #tpu.memory_space<vmem>>, vector<1x1x32xf32>
    %54 = vector.shape_cast %53 : vector<1x1x32xf32> to vector<1x32xf32>
    %55 = vector.broadcast %54 : vector<1x32xf32> to vector<8x32xf32>
    %56 = arith.addf %52, %55 : vector<8x32xf32>
    %57 = arith.addf %3, %56 : vector<8x32xf32>
    %c0_25 = arith.constant 0 : index
    %c0_26 = arith.constant 0 : index
    %c0_27 = arith.constant 0 : index
    %58 = vector.load %arg12[%c0_25, %c0_26, %c0_27] : memref<1x1x32xf32, #tpu.memory_space<vmem>>, vector<1x1x32xf32>
    %59 = vector.shape_cast %58 : vector<1x1x32xf32> to vector<1x32xf32>
    %c0_28 = arith.constant 0 : index
    %c0_29 = arith.constant 0 : index
    %c0_30 = arith.constant 0 : index
    %60 = vector.load %arg13[%c0_28, %c0_29, %c0_30] : memref<1x1x32xf32, #tpu.memory_space<vmem>>, vector<1x1x32xf32>
    %61 = vector.shape_cast %60 : vector<1x1x32xf32> to vector<1x32xf32>
    %cst_31 = arith.constant dense<0.000000e+00> : vector<8xf32>
    %62 = vector.multi_reduction <add>, %57, %cst_31 [1] : vector<8x32xf32> to vector<8xf32>
    %63 = vector.shape_cast %62 : vector<8xf32> to vector<8x1xf32>
    %cst_32 = arith.constant 3.200000e+01 : f32
    %64 = vector.broadcast %cst_32 : f32 to vector<8x1xf32>
    %65 = arith.divf %63, %64 : vector<8x1xf32>
    %66 = vector.broadcast %65 : vector<8x1xf32> to vector<8x32xf32>
    %67 = arith.subf %57, %66 : vector<8x32xf32>
    %68 = arith.mulf %67, %67 : vector<8x32xf32>
    %cst_33 = arith.constant dense<0.000000e+00> : vector<8xf32>
    %69 = vector.multi_reduction <add>, %68, %cst_33 [1] : vector<8x32xf32> to vector<8xf32>
    %70 = vector.shape_cast %69 : vector<8xf32> to vector<8x1xf32>
    %cst_34 = arith.constant 3.200000e+01 : f32
    %71 = vector.broadcast %cst_34 : f32 to vector<8x1xf32>
    %72 = arith.divf %70, %71 : vector<8x1xf32>
    %cst_35 = arith.constant 9.99999974E-6 : f32
    %73 = vector.broadcast %cst_35 : f32 to vector<8x1xf32>
    %74 = arith.addf %72, %73 : vector<8x1xf32>
    %75 = math.rsqrt %74 : vector<8x1xf32>
    %76 = vector.broadcast %75 : vector<8x1xf32> to vector<8x32xf32>
    %77 = arith.mulf %67, %76 : vector<8x32xf32>
    %78 = vector.broadcast %59 : vector<1x32xf32> to vector<8x32xf32>
    %79 = arith.mulf %77, %78 : vector<8x32xf32>
    %80 = vector.broadcast %61 : vector<1x32xf32> to vector<8x32xf32>
    %81 = arith.addf %79, %80 : vector<8x32xf32>
    %82 = arith.addf %3, %81 : vector<8x32xf32>
    %c0_36 = arith.constant 0 : index
    %c0_37 = arith.constant 0 : index
    %c0_38 = arith.constant 0 : index
    %83 = vector.load %arg14[%c0_36, %c0_37, %c0_38] : memref<1x1x32xf32, #tpu.memory_space<vmem>>, vector<1x1x32xf32>
    %84 = vector.shape_cast %83 : vector<1x1x32xf32> to vector<1x32xf32>
    %c0_39 = arith.constant 0 : index
    %c0_40 = arith.constant 0 : index
    %c0_41 = arith.constant 0 : index
    %85 = vector.load %arg15[%c0_39, %c0_40, %c0_41] : memref<1x1x32xf32, #tpu.memory_space<vmem>>, vector<1x1x32xf32>
    %86 = vector.shape_cast %85 : vector<1x1x32xf32> to vector<1x32xf32>
    %cst_42 = arith.constant dense<0.000000e+00> : vector<8xf32>
    %87 = vector.multi_reduction <add>, %82, %cst_42 [1] : vector<8x32xf32> to vector<8xf32>
    %88 = vector.shape_cast %87 : vector<8xf32> to vector<8x1xf32>
    %cst_43 = arith.constant 3.200000e+01 : f32
    %89 = vector.broadcast %cst_43 : f32 to vector<8x1xf32>
    %90 = arith.divf %88, %89 : vector<8x1xf32>
    %91 = vector.broadcast %90 : vector<8x1xf32> to vector<8x32xf32>
    %92 = arith.subf %82, %91 : vector<8x32xf32>
    %93 = arith.mulf %92, %92 : vector<8x32xf32>
    %cst_44 = arith.constant dense<0.000000e+00> : vector<8xf32>
    %94 = vector.multi_reduction <add>, %93, %cst_44 [1] : vector<8x32xf32> to vector<8xf32>
    %95 = vector.shape_cast %94 : vector<8xf32> to vector<8x1xf32>
    %cst_45 = arith.constant 3.200000e+01 : f32
    %96 = vector.broadcast %cst_45 : f32 to vector<8x1xf32>
    %97 = arith.divf %95, %96 : vector<8x1xf32>
    %cst_46 = arith.constant 9.99999974E-6 : f32
    %98 = vector.broadcast %cst_46 : f32 to vector<8x1xf32>
    %99 = arith.addf %97, %98 : vector<8x1xf32>
    %100 = math.rsqrt %99 : vector<8x1xf32>
    %101 = vector.broadcast %100 : vector<8x1xf32> to vector<8x32xf32>
    %102 = arith.mulf %92, %101 : vector<8x32xf32>
    %103 = vector.broadcast %84 : vector<1x32xf32> to vector<8x32xf32>
    %104 = arith.mulf %102, %103 : vector<8x32xf32>
    %105 = vector.broadcast %86 : vector<1x32xf32> to vector<8x32xf32>
    %106 = arith.addf %104, %105 : vector<8x32xf32>
    %c0_47 = arith.constant 0 : index
    %c0_48 = arith.constant 0 : index
    %c0_49 = arith.constant 0 : index
    %107 = vector.load %arg16[%c0_47, %c0_48, %c0_49] : memref<1x32x64xf32, #tpu.memory_space<vmem>>, vector<1x32x64xf32>
    %108 = vector.shape_cast %107 : vector<1x32x64xf32> to vector<32x64xf32>
    %cst_50 = arith.constant dense<0.000000e+00> : vector<8x64xf32>
    %109 = tpu.matmul %106, %108, %cst_50 {dimension_numbers = #tpu.dot_dimension_numbers<[1], [0], [0], [1], [0, 0, 1, 1], [], []>} : vector<8x32xf32>, vector<32x64xf32>, vector<8x64xf32> -> vector<8x64xf32>
    %c0_51 = arith.constant 0 : index
    %c0_52 = arith.constant 0 : index
    %c0_53 = arith.constant 0 : index
    %110 = vector.load %arg17[%c0_51, %c0_52, %c0_53] : memref<1x1x64xf32, #tpu.memory_space<vmem>>, vector<1x1x64xf32>
    %111 = vector.shape_cast %110 : vector<1x1x64xf32> to vector<1x64xf32>
    %112 = vector.broadcast %111 : vector<1x64xf32> to vector<8x64xf32>
    %113 = arith.addf %109, %112 : vector<8x64xf32>
    %cst_54 = arith.constant 5.000000e-01 : f32
    %114 = vector.broadcast %cst_54 : f32 to vector<8x64xf32>
    %115 = arith.mulf %114, %113 : vector<8x64xf32>
    %cst_55 = arith.constant 4.471500e-02 : f32
    %116 = vector.broadcast %cst_55 : f32 to vector<8x64xf32>
    %117 = arith.mulf %116, %113 : vector<8x64xf32>
    %118 = arith.mulf %117, %113 : vector<8x64xf32>
    %119 = arith.mulf %118, %113 : vector<8x64xf32>
    %120 = arith.addf %113, %119 : vector<8x64xf32>
    %cst_56 = arith.constant 0.797884583 : f32
    %121 = vector.broadcast %cst_56 : f32 to vector<8x64xf32>
    %122 = arith.mulf %121, %120 : vector<8x64xf32>
    %123 = math.tanh %122 : vector<8x64xf32>
    %cst_57 = arith.constant 1.000000e+00 : f32
    %124 = vector.broadcast %cst_57 : f32 to vector<8x64xf32>
    %125 = arith.addf %124, %123 : vector<8x64xf32>
    %126 = arith.mulf %115, %125 : vector<8x64xf32>
    %c0_58 = arith.constant 0 : index
    %c0_59 = arith.constant 0 : index
    %c0_60 = arith.constant 0 : index
    %127 = vector.load %arg18[%c0_58, %c0_59, %c0_60] : memref<1x64x32xf32, #tpu.memory_space<vmem>>, vector<1x64x32xf32>
    %128 = vector.shape_cast %127 : vector<1x64x32xf32> to vector<64x32xf32>
    %cst_61 = arith.constant dense<0.000000e+00> : vector<8x32xf32>
    %129 = tpu.matmul %126, %128, %cst_61 {dimension_numbers = #tpu.dot_dimension_numbers<[1], [0], [0], [1], [0, 0, 1, 1], [], []>} : vector<8x64xf32>, vector<64x32xf32>, vector<8x32xf32> -> vector<8x32xf32>
    %c0_62 = arith.constant 0 : index
    %c0_63 = arith.constant 0 : index
    %c0_64 = arith.constant 0 : index
    %130 = vector.load %arg19[%c0_62, %c0_63, %c0_64] : memref<1x1x32xf32, #tpu.memory_space<vmem>>, vector<1x1x32xf32>
    %131 = vector.shape_cast %130 : vector<1x1x32xf32> to vector<1x32xf32>
    %132 = vector.broadcast %131 : vector<1x32xf32> to vector<8x32xf32>
    %133 = arith.addf %129, %132 : vector<8x32xf32>
    %134 = arith.addf %106, %133 : vector<8x32xf32>
    %c0_65 = arith.constant 0 : index
    %c0_66 = arith.constant 0 : index
    %c0_67 = arith.constant 0 : index
    %135 = vector.load %arg20[%c0_65, %c0_66, %c0_67] : memref<1x1x32xf32, #tpu.memory_space<vmem>>, vector<1x1x32xf32>
    %136 = vector.shape_cast %135 : vector<1x1x32xf32> to vector<1x32xf32>
    %c0_68 = arith.constant 0 : index
    %c0_69 = arith.constant 0 : index
    %c0_70 = arith.constant 0 : index
    %137 = vector.load %arg21[%c0_68, %c0_69, %c0_70] : memref<1x1x32xf32, #tpu.memory_space<vmem>>, vector<1x1x32xf32>
    %138 = vector.shape_cast %137 : vector<1x1x32xf32> to vector<1x32xf32>
    %cst_71 = arith.constant dense<0.000000e+00> : vector<8xf32>
    %139 = vector.multi_reduction <add>, %134, %cst_71 [1] : vector<8x32xf32> to vector<8xf32>
    %140 = vector.shape_cast %139 : vector<8xf32> to vector<8x1xf32>
    %cst_72 = arith.constant 3.200000e+01 : f32
    %141 = vector.broadcast %cst_72 : f32 to vector<8x1xf32>
    %142 = arith.divf %140, %141 : vector<8x1xf32>
    %143 = vector.broadcast %142 : vector<8x1xf32> to vector<8x32xf32>
    %144 = arith.subf %134, %143 : vector<8x32xf32>
    %145 = arith.mulf %144, %144 : vector<8x32xf32>
    %cst_73 = arith.constant dense<0.000000e+00> : vector<8xf32>
    %146 = vector.multi_reduction <add>, %145, %cst_73 [1] : vector<8x32xf32> to vector<8xf32>
    %147 = vector.shape_cast %146 : vector<8xf32> to vector<8x1xf32>
    %cst_74 = arith.constant 3.200000e+01 : f32
    %148 = vector.broadcast %cst_74 : f32 to vector<8x1xf32>
    %149 = arith.divf %147, %148 : vector<8x1xf32>
    %cst_75 = arith.constant 9.99999974E-6 : f32
    %150 = vector.broadcast %cst_75 : f32 to vector<8x1xf32>
    %151 = arith.addf %149, %150 : vector<8x1xf32>
    %152 = math.rsqrt %151 : vector<8x1xf32>
    %153 = vector.broadcast %152 : vector<8x1xf32> to vector<8x32xf32>
    %154 = arith.mulf %144, %153 : vector<8x32xf32>
    %155 = vector.broadcast %136 : vector<1x32xf32> to vector<8x32xf32>
    %156 = arith.mulf %154, %155 : vector<8x32xf32>
    %157 = vector.broadcast %138 : vector<1x32xf32> to vector<8x32xf32>
    %158 = arith.addf %156, %157 : vector<8x32xf32>
    %c0_76 = arith.constant 0 : index
    %c0_77 = arith.constant 0 : index
    %159 = vector.load %arg29[%c0_76, %c0_77] : memref<8x32xf32, #tpu.memory_space<vmem>>, vector<8x32xf32>
    tpu.vector_store %arg29[%c0_76, %c0_77], %158 {strides = array<i32>} : memref<8x32xf32, #tpu.memory_space<vmem>>, vector<8x32xf32>,
    %c1_i32 = arith.constant 1 : i32
    %160 = arith.cmpi eq, %arg1, %c1_i32 : i32
    %161 = arith.extui %160 : i1 to i32
    %c0_i32_78 = arith.constant 0 : i32
    %162 = arith.cmpi ne, %161, %c0_i32_78 : i32
    scf.if %162 {
      %163 = vector.shape_cast %158 : vector<8x32xf32> to vector<1x8x32xf32>
      %164 = vector.extract_strided_slice %163 {offsets = [0, 0, 0], sizes = [1, 1, 32], strides = [1, 1, 1]} : vector<1x8x32xf32> to vector<1x1x32xf32>
      %165 = vector.shape_cast %164 : vector<1x1x32xf32> to vector<1x32xf32>
      %c0_79 = arith.constant 0 : index
      %c0_80 = arith.constant 0 : index
      %166 = vector.load %arg22[%c0_79, %c0_80] : memref<32x32xf32, #tpu.memory_space<vmem>>, vector<32x32xf32>
      %cst_81 = arith.constant dense<0.000000e+00> : vector<1x32xf32>
      %167 = tpu.matmul %165, %166, %cst_81 {dimension_numbers = #tpu.dot_dimension_numbers<[1], [0], [0], [1], [0, 0, 1, 1], [], []>} : vector<1x32xf32>, vector<32x32xf32>, vector<1x32xf32> -> vector<1x32xf32>
      %c0_82 = arith.constant 0 : index
      %c0_83 = arith.constant 0 : index
      %168 = vector.load %arg23[%c0_82, %c0_83] : memref<1x32xf32, #tpu.memory_space<vmem>>, vector<1x32xf32>
      %169 = arith.addf %167, %168 : vector<1x32xf32>
      %170 = math.tanh %169 : vector<1x32xf32>
      %c0_84 = arith.constant 0 : index
      %c0_85 = arith.constant 0 : index
      %171 = vector.load %arg24[%c0_84, %c0_85] : memref<1x32xf32, #tpu.memory_space<vmem>>, vector<1x32xf32>
      %c0_86 = arith.constant 0 : index
      %c0_87 = arith.constant 0 : index
      %172 = vector.load %arg25[%c0_86, %c0_87] : memref<1x32xf32, #tpu.memory_space<vmem>>, vector<1x32xf32>
      %cst_88 = arith.constant dense<0.000000e+00> : vector<1xf32>
      %173 = vector.multi_reduction <add>, %170, %cst_88 [1] : vector<1x32xf32> to vector<1xf32>
      %174 = vector.shape_cast %173 : vector<1xf32> to vector<1x1xf32>
      %cst_89 = arith.constant 3.200000e+01 : f32
      %175 = vector.broadcast %cst_89 : f32 to vector<1x1xf32>
      %176 = arith.divf %174, %175 : vector<1x1xf32>
      %177 = vector.broadcast %176 : vector<1x1xf32> to vector<1x32xf32>
      %178 = arith.subf %170, %177 : vector<1x32xf32>
      %179 = arith.mulf %178, %178 : vector<1x32xf32>
      %cst_90 = arith.constant dense<0.000000e+00> : vector<1xf32>
      %180 = vector.multi_reduction <add>, %179, %cst_90 [1] : vector<1x32xf32> to vector<1xf32>
      %181 = vector.shape_cast %180 : vector<1xf32> to vector<1x1xf32>
      %cst_91 = arith.constant 3.200000e+01 : f32
      %182 = vector.broadcast %cst_91 : f32 to vector<1x1xf32>
      %183 = arith.divf %181, %182 : vector<1x1xf32>
      %cst_92 = arith.constant 9.99999974E-6 : f32
      %184 = vector.broadcast %cst_92 : f32 to vector<1x1xf32>
      %185 = arith.addf %183, %184 : vector<1x1xf32>
      %186 = math.rsqrt %185 : vector<1x1xf32>
      %187 = vector.broadcast %186 : vector<1x1xf32> to vector<1x32xf32>
      %188 = arith.mulf %178, %187 : vector<1x32xf32>
      %189 = arith.mulf %188, %171 : vector<1x32xf32>
      %190 = arith.addf %189, %172 : vector<1x32xf32>
      %c0_93 = arith.constant 0 : index
      %c0_94 = arith.constant 0 : index
      %191 = vector.load %arg26[%c0_93, %c0_94] : memref<32x2xf32, #tpu.memory_space<vmem>>, vector<32x2xf32>
      %cst_95 = arith.constant dense<0.000000e+00> : vector<1x2xf32>
      %192 = tpu.matmul %190, %191, %cst_95 {dimension_numbers = #tpu.dot_dimension_numbers<[1], [0], [0], [1], [0, 0, 1, 1], [], []>} : vector<1x32xf32>, vector<32x2xf32>, vector<1x2xf32> -> vector<1x2xf32>
      %c0_96 = arith.constant 0 : index
      %c0_97 = arith.constant 0 : index
      %193 = vector.load %arg27[%c0_96, %c0_97] : memref<1x2xf32, #tpu.memory_space<vmem>>, vector<1x2xf32>
      %194 = arith.addf %192, %193 : vector<1x2xf32>
      %195 = vector.shape_cast %194 : vector<1x2xf32> to vector<1x1x2xf32>
      %c0_98 = arith.constant 0 : index
      %c0_99 = arith.constant 0 : index
      %c0_100 = arith.constant 0 : index
      %196 = vector.load %arg28[%c0_98, %c0_99, %c0_100] : memref<1x1x2xf32, #tpu.memory_space<vmem>>, vector<1x1x2xf32>
      tpu.vector_store %arg28[%c0_98, %c0_99, %c0_100], %195 {strides = array<i32>} : memref<1x1x2xf32, #tpu.memory_space<vmem>>, vector<1x1x2xf32>,
    } else {
    }
    return
  }
  func.func @transform_0(%arg0: i32, %arg1: i32) -> (i32, i32, i32) {
    %c0_i32 = arith.constant 0 : i32
    %c0_i32_0 = arith.constant 0 : i32
    %c0_i32_1 = arith.constant 0 : i32
    return %arg0, %c0_i32, %c0_i32_0 : i32, i32, i32
  }
  func.func @transform_1(%arg0: i32, %arg1: i32) -> (i32, i32, i32) {
    %c0_i32 = arith.constant 0 : i32
    %c0_i32_0 = arith.constant 0 : i32
    %c0_i32_1 = arith.constant 0 : i32
    return %arg0, %c0_i32, %c0_i32_0 : i32, i32, i32
  }
  func.func @transform_2(%arg0: i32, %arg1: i32) -> (i32, i32) {
    %c0_i32 = arith.constant 0 : i32
    %c0_i32_0 = arith.constant 0 : i32
    %c0_i32_1 = arith.constant 0 : i32
    return %c0_i32, %c0_i32_0 : i32, i32
  }
  func.func @transform_3(%arg0: i32, %arg1: i32) -> (i32, i32) {
    %c0_i32 = arith.constant 0 : i32
    %c0_i32_0 = arith.constant 0 : i32
    %c0_i32_1 = arith.constant 0 : i32
    return %c0_i32, %c0_i32_0 : i32, i32
  }
  func.func @transform_4(%arg0: i32, %arg1: i32) -> (i32, i32) {
    %c0_i32 = arith.constant 0 : i32
    %c0_i32_0 = arith.constant 0 : i32
    %c0_i32_1 = arith.constant 0 : i32
    return %c0_i32, %c0_i32_0 : i32, i32
  }
  func.func @transform_5(%arg0: i32, %arg1: i32) -> (i32, i32, i32) {
    %c0_i32 = arith.constant 0 : i32
    %c0_i32_0 = arith.constant 0 : i32
    %c0_i32_1 = arith.constant 0 : i32
    return %arg0, %c0_i32, %c0_i32_0 : i32, i32, i32
  }
  func.func @transform_6(%arg0: i32, %arg1: i32) -> (i32, i32, i32) {
    %c0_i32 = arith.constant 0 : i32
    %c0_i32_0 = arith.constant 0 : i32
    %c0_i32_1 = arith.constant 0 : i32
    return %arg1, %c0_i32, %c0_i32_0 : i32, i32, i32
  }
  func.func @transform_7(%arg0: i32, %arg1: i32) -> (i32, i32, i32) {
    %c0_i32 = arith.constant 0 : i32
    %c0_i32_0 = arith.constant 0 : i32
    %c0_i32_1 = arith.constant 0 : i32
    return %arg1, %c0_i32, %c0_i32_0 : i32, i32, i32
  }
  func.func @transform_8(%arg0: i32, %arg1: i32) -> (i32, i32, i32) {
    %c0_i32 = arith.constant 0 : i32
    %c0_i32_0 = arith.constant 0 : i32
    %c0_i32_1 = arith.constant 0 : i32
    return %arg1, %c0_i32, %c0_i32_0 : i32, i32, i32
  }
  func.func @transform_9(%arg0: i32, %arg1: i32) -> (i32, i32, i32) {
    %c0_i32 = arith.constant 0 : i32
    %c0_i32_0 = arith.constant 0 : i32
    %c0_i32_1 = arith.constant 0 : i32
    return %arg1, %c0_i32, %c0_i32_0 : i32, i32, i32
  }
  func.func @transform_10(%arg0: i32, %arg1: i32) -> (i32, i32, i32) {
    %c0_i32 = arith.constant 0 : i32
    %c0_i32_0 = arith.constant 0 : i32
    %c0_i32_1 = arith.constant 0 : i32
    return %arg1, %c0_i32, %c0_i32_0 : i32, i32, i32
  }
  func.func @transform_11(%arg0: i32, %arg1: i32) -> (i32, i32, i32) {
    %c0_i32 = arith.constant 0 : i32
    %c0_i32_0 = arith.constant 0 : i32
    %c0_i32_1 = arith.constant 0 : i32
    return %arg1, %c0_i32, %c0_i32_0 : i32, i32, i32
  }
  func.func @transform_12(%arg0: i32, %arg1: i32) -> (i32, i32, i32) {
    %c0_i32 = arith.constant 0 : i32
    %c0_i32_0 = arith.constant 0 : i32
    %c0_i32_1 = arith.constant 0 : i32
    return %arg1, %c0_i32, %c0_i32_0 : i32, i32, i32
  }
  func.func @transform_13(%arg0: i32, %arg1: i32) -> (i32, i32, i32) {
    %c0_i32 = arith.constant 0 : i32
    %c0_i32_0 = arith.constant 0 : i32
    %c0_i32_1 = arith.constant 0 : i32
    return %arg1, %c0_i32, %c0_i32_0 : i32, i32, i32
  }
  func.func @transform_14(%arg0: i32, %arg1: i32) -> (i32, i32, i32) {
    %c0_i32 = arith.constant 0 : i32
    %c0_i32_0 = arith.constant 0 : i32
    %c0_i32_1 = arith.constant 0 : i32
    return %arg1, %c0_i32, %c0_i32_0 : i32, i32, i32
  }
  func.func @transform_15(%arg0: i32, %arg1: i32) -> (i32, i32, i32) {
    %c0_i32 = arith.constant 0 : i32
    %c0_i32_0 = arith.constant 0 : i32
    %c0_i32_1 = arith.constant 0 : i32
    return %arg1, %c0_i32, %c0_i32_0 : i32, i32, i32
  }
  func.func @transform_16(%arg0: i32, %arg1: i32) -> (i32, i32, i32) {
    %c0_i32 = arith.constant 0 : i32
    %c0_i32_0 = arith.constant 0 : i32
    %c0_i32_1 = arith.constant 0 : i32
    return %arg1, %c0_i32, %c0_i32_0 : i32, i32, i32
  }
  func.func @transform_17(%arg0: i32, %arg1: i32) -> (i32, i32, i32) {
    %c0_i32 = arith.constant 0 : i32
    %c0_i32_0 = arith.constant 0 : i32
    %c0_i32_1 = arith.constant 0 : i32
    return %arg1, %c0_i32, %c0_i32_0 : i32, i32, i32
  }
  func.func @transform_18(%arg0: i32, %arg1: i32) -> (i32, i32, i32) {
    %c0_i32 = arith.constant 0 : i32
    %c0_i32_0 = arith.constant 0 : i32
    %c0_i32_1 = arith.constant 0 : i32
    return %arg1, %c0_i32, %c0_i32_0 : i32, i32, i32
  }
  func.func @transform_19(%arg0: i32, %arg1: i32) -> (i32, i32, i32) {
    %c0_i32 = arith.constant 0 : i32
    %c0_i32_0 = arith.constant 0 : i32
    %c0_i32_1 = arith.constant 0 : i32
    return %arg1, %c0_i32, %c0_i32_0 : i32, i32, i32
  }
  func.func @transform_20(%arg0: i32, %arg1: i32) -> (i32, i32) {
    %c0_i32 = arith.constant 0 : i32
    %c0_i32_0 = arith.constant 0 : i32
    %c0_i32_1 = arith.constant 0 : i32
    return %c0_i32, %c0_i32_0 : i32, i32
  }
  func.func @transform_21(%arg0: i32, %arg1: i32) -> (i32, i32) {
    %c0_i32 = arith.constant 0 : i32
    %c0_i32_0 = arith.constant 0 : i32
    %c0_i32_1 = arith.constant 0 : i32
    return %c0_i32, %c0_i32_0 : i32, i32
  }
  func.func @transform_22(%arg0: i32, %arg1: i32) -> (i32, i32) {
    %c0_i32 = arith.constant 0 : i32
    %c0_i32_0 = arith.constant 0 : i32
    %c0_i32_1 = arith.constant 0 : i32
    return %c0_i32, %c0_i32_0 : i32, i32
  }
  func.func @transform_23(%arg0: i32, %arg1: i32) -> (i32, i32) {
    %c0_i32 = arith.constant 0 : i32
    %c0_i32_0 = arith.constant 0 : i32
    %c0_i32_1 = arith.constant 0 : i32
    return %c0_i32, %c0_i32_0 : i32, i32
  }
  func.func @transform_24(%arg0: i32, %arg1: i32) -> (i32, i32) {
    %c0_i32 = arith.constant 0 : i32
    %c0_i32_0 = arith.constant 0 : i32
    %c0_i32_1 = arith.constant 0 : i32
    return %c0_i32, %c0_i32_0 : i32, i32
  }
  func.func @transform_25(%arg0: i32, %arg1: i32) -> (i32, i32) {
    %c0_i32 = arith.constant 0 : i32
    %c0_i32_0 = arith.constant 0 : i32
    %c0_i32_1 = arith.constant 0 : i32
    return %c0_i32, %c0_i32_0 : i32, i32
  }
  func.func @transform_26(%arg0: i32, %arg1: i32) -> (i32, i32, i32) {
    %c0_i32 = arith.constant 0 : i32
    %c0_i32_0 = arith.constant 0 : i32
    %c0_i32_1 = arith.constant 0 : i32
    return %arg0, %c0_i32, %c0_i32_0 : i32, i32, i32
  }
}

</mosaic_0001>

<bundles_post_ra>
// kernel: tpu_custom_call.1
= control target key start
LH: loop header
LB: loop body
LE: loop exit
PB: predicated region body
PF: predicated region fallthrough
CT: control target
= control target key end

     0   :  { %s5751_s0 = inlined_call_operand.hbm [shape: f32[2,8,32], index: 0, kind: input, shape index: {}]   ;;  %s5752_s1 = inlined_call_operand.hbm [shape: f32[2,8,32], index: 1, kind: input, shape index: {}]   ;;  %s5753_s2 = inlined_call_operand.hbm [shape: f32[8,32], index: 2, kind: input, shape index: {}]   ;;  %s5754_s3 = inlined_call_operand.hbm [shape: f32[1,32], index: 3, kind: input, shape index: {}]   ;;  %s5755_s4 = inlined_call_operand.hbm [shape: f32[1,32], index: 4, kind: input, shape index: {}]   ;;  %s5756_s5 = inlined_call_operand.vmem [shape: s32[2,1,8], index: 5, kind: input, shape index: {}]   ;;  %s5757_s6 = inlined_call_operand.vmem [shape: f32[2,32,96], index: 6, kind: input, shape index: {}]   ;;  %s5758_s7 = inlined_call_operand.hbm [shape: f32[2,1,96], index: 7, kind: input, shape index: {}]   ;;  %s5759_s8 = inlined_call_operand.vmem [shape: f32[2,32,32], index: 8, kind: input, shape index: {}]   ;;  %s5760_s9 = inlined_call_operand.hbm [shape: f32[2,1,32], index: 9, kind: input, shape index: {}]   ;;  %s5761_s10 = inlined_call_operand.hbm [shape: f32[2,1,32], index: 10, kind: input, shape index: {}]   ;;  %s5762_s11 = inlined_call_operand.hbm [shape: f32[2,1,32], index: 11, kind: input, shape index: {}]   ;;  %s5763_s12 = inlined_call_operand.hbm [shape: f32[2,1,32], index: 12, kind: input, shape index: {}]   ;;  %s5764_s13 = inlined_call_operand.hbm [shape: f32[2,1,32], index: 13, kind: input, shape index: {}]   ;;  %s5765_s14 = inlined_call_operand.vmem [shape: f32[2,32,64], index: 14, kind: input, shape index: {}]   ;;  %s5766_s15 = inlined_call_operand.hbm [shape: f32[2,1,64], index: 15, kind: input, shape index: {}]   ;;  %s5767_s16 = inlined_call_operand.vmem [shape: f32[2,64,32], index: 16, kind: input, shape index: {}]   ;;  %s5768_s17 = inlined_call_operand.hbm [shape: f32[2,1,32], index: 17, kind: input, shape index: {}]   ;;  %s5769_s18 = inlined_call_operand.vmem [shape: f32[2,1,32], index: 18, kind: input, shape index: {}]   ;;  %s5770_s19 = inlined_call_operand.vmem [shape: f32[2,1,32], index: 19, kind: input, shape index: {}]   ;;  %s5771_s20 = inlined_call_operand.vmem [shape: f32[32,32], index: 20, kind: input, shape index: {}]   ;;  %s5772_s21 = inlined_call_operand.vmem [shape: f32[1,32], index: 21, kind: input, shape index: {}]   ;;  %s5773_s22 = inlined_call_operand.vmem [shape: f32[1,32], index: 22, kind: input, shape index: {}]   ;;  %s5774_s23 = inlined_call_operand.vmem [shape: f32[1,32], index: 23, kind: input, shape index: {}]   ;;  %s5775_s24 = inlined_call_operand.vmem [shape: f32[32,2], index: 24, kind: input, shape index: {}]   ;;  %s5776_s25 = inlined_call_operand.vmem [shape: f32[1,2], index: 25, kind: input, shape index: {}]   ;;  %s5777_s26 = inlined_call_operand.hbm [shape: f32[2,1,2], index: 26, kind: output, shape index: {}]  }
   0x1   :  { %5826 = sst [smem:[#allocation50_spill]] %s5751_s0 }
   0x2   :  { %5827 = sst [smem:[#allocation51_spill]] %s5752_s1 }
   0x3   :  { %5828 = sst [smem:[#allocation52_spill]] %s5753_s2 }
   0x4   :  { %5829 = sst [smem:[#allocation53_spill]] %s5754_s3 }
   0x5   :  { %5830 = sst [smem:[#allocation54_spill]] %s5755_s4 }
   0x6   :  { %5831 = sst [smem:[#allocation55_spill]] %s5756_s5 }
   0x7   :  { %5832 = sst [smem:[#allocation56_spill]] %s5757_s6 }
   0x8   :  { %5833 = sst [smem:[#allocation57_spill]] %s5758_s7 }
   0x9   :  { %5834 = sst [smem:[#allocation58_spill]] %s5759_s8 }
   0xa   :  { %5835 = sst [smem:[#allocation59_spill]] %s5760_s9 }
   0xb   :  { %5836 = sst [smem:[#allocation60_spill]] %s5761_s10 }
   0xc   :  { %5837 = sst [smem:[#allocation61_spill]] %s5762_s11 }
   0xd   :  { %5838 = sst [smem:[#allocation62_spill]] %s5763_s12 }
   0xe   :  { %5839 = sst [smem:[#allocation63_spill]] %s5764_s13 }
   0xf   :  { %5840 = sst [smem:[#allocation64_spill]] %s5765_s14 }
  0x10   :  { %5841 = sst [smem:[#allocation65_spill]] %s5766_s15 }
  0x11   :  { %5842 = sst [smem:[#allocation66_spill]] %s5767_s16 }
  0x12   :  { %5843 = sst [smem:[#allocation67_spill]] %s5768_s17 }
  0x13   :  { %5844 = sst [smem:[#allocation68_spill]] %s5769_s18 }
  0x14   :  { %5845 = sst [smem:[#allocation69_spill]] %s5770_s19 }
  0x15   :  { %5846 = sst [smem:[#allocation70_spill]] %s5771_s20 }
  0x16   :  { %5847 = sst [smem:[#allocation71_spill]] %s5772_s21 }
  0x17   :  { %5848 = sst [smem:[#allocation72_spill]] %s5773_s22 }
  0x18   :  { %5849 = sst [smem:[#allocation73_spill]] %s5774_s23 }
  0x19   :  { %5850 = sst [smem:[#allocation74_spill]] %s5775_s24 }
  0x1a   :  { %5851 = sst [smem:[#allocation75_spill]] %s5776_s25 }
  0x1b   :  { %5852 = sst [smem:[#allocation76_spill]] %s5777_s26 }
  0x1c   :  { %31 = vsyncpa [#allocation4], 0 }
  0x1d   :  { %33 = vsyncpa [#allocation4 + $0x1], 0 }
  0x1e   :  { %34 = vsyncpa [#allocation7], 0 }
  0x1f   :  { %36 = vsyncpa [#allocation7 + $0x1], 0 }
  0x20   :  { %37 = vsyncpa [#allocation10], 0 }
  0x21   :  { %38 = vsyncpa [#allocation13], 0 }
  0x22   :  { %40 = vsyncpa [#allocation13 + $0x1], 0 }
  0x23   :  { %41 = vsyncpa [#allocation16], 0 }
  0x24   :  { %43 = vsyncpa [#allocation16 + $0x1], 0 }
  0x25   :  { %44 = vsyncpa [#allocation19], 0 }
  0x26   :  { %46 = vsyncpa [#allocation19 + $0x1], 0 }
  0x27   :  { %47 = vsyncpa [#allocation22], 0 }
  0x28   :  { %49 = vsyncpa [#allocation22 + $0x1], 0 }
  0x29   :  { %50 = vsyncpa [#allocation5], 0 }
  0x2a   :  { %52 = vsyncpa [#allocation5 + $0x1], 0  ;;  %s4769_s27 = smov 0   ;;  %s4771_s3 = smov 0  }
  0x2b   :  { %s4773_s7 = smov 0   ;;  %s4775_s28 = smov 0  }
  0x2c   :  { %s4777_s8 = smov 0   ;;  %s4779_s4 = smov 0  }
  0x2d   :  { %s4781_s29 = smov 0   ;;  %s4783_s0 = smov 0  }
  0x2e   :  { %s4785_s9 = smov 0   ;;  %s4787_s30 = smov 0  }
  0x2f   :  { %s4789_s2 = smov 0  }
  0x30 LB: > { %5853 = sst [smem:[#allocation34_spill]] %s4565_s3  ;;  %s4823_s5 = sadd.s32 4294967295, %s4601_s2   ;;  %s4601_s2 = sphi %s4789_s2, %s58_s2   ;;  %s4597_s30 = sphi %s4787_s30, %s5969_s30   ;;  %s4593_s9 = sphi %s4785_s9, %s5968_s9   ;;  %s4589_s0 = sphi %s4783_s0, %s5967_s0   ;;  %s4585_s29 = sphi %s4781_s29, %s5966_s29   ;;  %s4581_s4 = sphi %s4779_s4, %s5965_s4   ;;  %s4577_s8 = sphi %s4777_s8, %s5964_s8   ;;  %s4573_s28 = sphi %s4775_s28, %s5963_s28   ;;  %s4569_s7 = sphi %s4773_s7, %s5962_s7   ;;  %s4565_s3 = sphi %s4771_s3, %s5961_s3   ;;  %s4561_s27 = sphi %s4769_s27, %s5960_s27  }
  0x31   : > { %5854 = sst [smem:[#allocation35_spill]] %s4569_s7  ;;  %p5791_p0 = scmp.eq.s32.totalorder %s4601_s2, 0 }
  0x32   : > { %5855 = sst [smem:[#allocation36_spill]] %s4573_s28  ;;  %p5790_p1 = scmp.eq.s32.totalorder %s4823_s5, 0 }
  0x33   : > { %5856 = sst [smem:[#allocation37_spill]] %s4577_s8  ;;  %p251_p2 = scmp.ne.s32.totalorder %s4569_s7, %s4565_s3 }
  0x34   : > { %5857 = sst [smem:[#allocation38_spill]] %s4581_s4  ;;  %p257_p3 = scmp.ne.s32.totalorder %s4565_s3, %s4561_s27 }
  0x35   : > { %5858 = sst [smem:[#allocation39_spill]] %s4585_s29  ;;  %p3558_p4 = scmp.ge.s32.totalorder %s4601_s2, 1 }
  0x36   : > { %5859 = sst [smem:[#allocation40_spill]] %s4589_s0  ;;  %p253_p5 = por %p251_p2, %p5791_p0 }
  0x37   : > { %5860 = sst [smem:[#allocation41_spill]] %s4593_s9  ;;  %p732_p6 = scmp.lt.s32.totalorder %s4601_s2, 5 }
  0x38   : > { %5861 = sst [smem:[#allocation42_spill]] %s4597_s30  ;;  %p4836_p7 = por %p257_p3, %p5790_p1 }
  0x39   : > { %p4840_p8 = pnand %p3558_p4, %p732_p6  ;;  %s4603_s1 = smov [#allocation8]  }
  0x3a   : > { %s5862_s10 = scalar_select %p4836_p7, 1, 0 }
  0x3b   : > { %s5864_s6 = scalar_select %p4840_p8, 1, 0 }
  0x3c   : > { %5863 = sst [smem:[#allocation43_spill]] %s5862_s10  ;;  %s745_s26 = sshll.u32 %s4603_s1, 4  ;;  %s746_s26 = int_to_ptr.vmem [resolvable:$true] %s745_s26 }
  0x3d   : > { %5865 = sst [smem:[#allocation44_spill]] %s5864_s6  ;;  %p3876_p9 = pneg %p4840_p8 }
  0x3e   : > { %p5789_p10 = scmp.lt.s32.totalorder %s4601_s2, 4  ;;  %s4604_s25 = smov [#allocation9]  }
  0x3f   : > { %p4849_p11 = pnand %p3876_p9, %p5790_p1  ;;  %s756_s23 = sshll.u32 %s4604_s25, 4  ;;  %s4859_s23 = int_to_ptr.vmem [resolvable:$true] %s756_s23 }
  0x40   : > { %p4855_p12 = pnand %p5789_p10, %p253_p5  ;;  %s5868_s21 = sld [smem:[#allocation52_spill]] }
  0x41   : > { %s5866_s27 = scalar_select %p4849_p11, 1, 0 }
  0x42   : > { %s5867_s22 = scalar_select %p4855_p12, 1, 0 }
  0x43   : > { %p4869_p2 = pneg %p4849_p11 }
  0x45   : > { %s5869_s16 = scalar_select %p4869_p2, 1, 0 }
  0x46   : > { %s4067_s20 = scalar_lea.hbm %s5868_s21, 128 }
  0x47   : > { %p4068_p13 = scmp.ne.s32.totalorder %s5868_s21, %s4067_s20  ;;  %p4074_p5 = scmp.lt.u32.totalorder %s4067_s20, %s5868_s21 }
  0x49   : > { %p4070_p3 = pnand %p4869_p2, %p4068_p13 }
  0x4b   : > { %p4071_p4 = pneg %p4070_p3 }
  0x4d   : > { %p4076_p6 = pnand %p4074_p5, %p4071_p4 }
  0x4f   : > { %4079 = shalt.err (!%p4076_p6)
}
  0x50   : > { %s4080_s24 = scalar_lea.vmem %s746_s26, 128  ;;  %p4088_p0 = scmp.lt.s32.totalorder %s746_s26, %s746_s26 }
  0x51   : > { %p4081_p9 = scmp.ne.s32.totalorder %s746_s26, %s4080_s24  ;;  %p4089_p7 = scmp.lt.s32.totalorder %s4080_s24, %s4080_s24 }
  0x53   : > { %p4083_p10 = pnand %p4081_p9, %p4869_p2  ;;  %p4090_p8 = por %p4089_p7, %p4088_p0 }
  0x55   : > { %p4084_p1 = pneg %p4083_p10 }
  0x57   : > { %p4091_p12 = pnand %p4090_p8, %p4084_p1 }
  0x59   : > { %4094 = shalt.err (!%p4091_p12)
}
  0x5a   : > { %3879 = dma.hbm_to_vmem [thread:$0]  (!%p4849_p11), %s5868_s21, 128, %s746_s26, [#allocation7]  }
  0x5b   : > { %s5870_s1 = sld [smem:[#allocation53_spill]] }
  0x61   : > { %s4095_s25 = scalar_lea.hbm %s5870_s1, 16 }
  0x62   : > { %p4096_p10 = scmp.ne.s32.totalorder %s5870_s1, %s4095_s25  ;;  %p4102_p1 = scmp.lt.u32.totalorder %s4095_s25, %s5870_s1 }
  0x64   : > { %p4098_p13 = pnand %p4096_p10, %p4869_p2 }
  0x66   : > { %p4099_p0 = pneg %p4098_p13 }
  0x68   : > { %p4104_p7 = pnand %p4102_p1, %p4099_p0 }
  0x6a   : > { %4107 = shalt.err (!%p4104_p7)
}
  0x6b   : > { %s4108_s26 = scalar_lea.vmem %s4859_s23, 16  ;;  %s4115_s29 = scalar_lea.vmem %s4859_s23, 32 }
  0x6c   : > { %p4109_p8 = scmp.ne.s32.totalorder %s4859_s23, %s4108_s26  ;;  %p4116_p4 = scmp.lt.s32.totalorder %s4859_s23, %s4859_s23 }
  0x6d   : > { %p4117_p5 = scmp.lt.s32.totalorder %s4115_s29, %s4108_s26 }
  0x6e   : > { %p4111_p12 = pnand %p4109_p8, %p4869_p2 }
  0x6f   : > { %p4118_p6 = por %p4117_p5, %p4116_p4 }
  0x70   : > { %p4112_p3 = pneg %p4111_p12 }
  0x72   : > { %p4119_p9 = pnand %p4118_p6, %p4112_p3 }
  0x74   : > { %4122 = shalt.err (!%p4119_p9)
}
  0x75   : > { %3882 = dma.hbm_to_vmem [thread:$0]  (!%p4849_p11), %s5870_s1, 16, %s4859_s23, [#allocation10]  }
  0x76   : > { %s4910_s18 = sand.u32 1, %s4601_s2   ;;  %s4913_s19 = sand.u32 1, %s4569_s7  }
  0x77   : > { %s4916_s14 = sshll.u32 %s4593_s9, 4  ;;  %s849_s20 = scalar_lea.vmem [#allocation12], %s4913_s19 }
  0x78   : > { %s856_s25 = sshll.u32 %s849_s20, 4  ;;  %s5871_s29 = sld [smem:[#allocation57_spill]]  ;;  %s4925_s25 = int_to_ptr.vmem [resolvable:$true] %s856_s25 }
  0x79   : > { %p5873_p13 = scmp.ne.s32.totalorder %s5867_s22, 0 }
  0x7b   : > { %p4932_p0 = pneg %p5873_p13 }
  0x7e   : > { %s5872_s21 = smov %s5871_s29  ;;  %s4923_s0 = scalar_lea.hbm %s5871_s29, %s4916_s14 }
  0x7f   : > { %s4123_s10 = scalar_lea.hbm %s4923_s0, 16  ;;  %s4128_s26 = scalar_lea.hbm %s5872_s21, 32 }
  0x80   : > { %p4124_p10 = scmp.ne.s32.totalorder %s4923_s0, %s4123_s10  ;;  %p4129_p8 = scmp.lt.u32.totalorder %s4923_s0, %s5872_s21 }
  0x81   : > { %p4130_p12 = scmp.lt.u32.totalorder %s4128_s26, %s4123_s10  ;;  %p4132_p4 = scmp.lt.u32.totalorder %s4123_s10, %s4923_s0 }
  0x82   : > { %p4126_p1 = pnand %p4932_p0, %p4124_p10 }
  0x83   : > { %p4131_p3 = por %p4130_p12, %p4129_p8 }
  0x84   : > { %p4127_p7 = pneg %p4126_p1 }
  0x85   : > { %p4133_p5 = por %p4132_p4, %p4131_p3 }
  0x87   : > { %p4134_p6 = pnand %p4133_p5, %p4127_p7 }
  0x89   : > { %4137 = shalt.err (!%p4134_p6)
}
  0x8a   : > { %s4138_s23 = scalar_lea.vmem %s4925_s25, 16  ;;  %s4605_s20 = smov [#allocation12]  }
  0x8b   : > { %p4139_p9 = scmp.ne.s32.totalorder %s4925_s25, %s4138_s23  ;;  %s4143_s24 = sshll.u32 %s4605_s20, 4  ;;  %s4144_s24 = int_to_ptr.vmem [resolvable:$false] %s4143_s24 }
  0x8c   : > { %s4145_s3 = scalar_lea.vmem %s4144_s24, 32  ;;  %p4146_p11 = scmp.lt.s32.totalorder %s4925_s25, %s4144_s24 }
  0x8d   : > { %p4141_p10 = pnand %p4139_p9, %p4932_p0  ;;  %p4147_p2 = scmp.lt.s32.totalorder %s4145_s3, %s4138_s23 }
  0x8f   : > { %p4142_p1 = pneg %p4141_p10  ;;  %p4148_p8 = por %p4147_p2, %p4146_p11 }
  0x91   : > { %p4149_p12 = pnand %p4148_p8, %p4142_p1 }
  0x93   : > { %4152 = shalt.err (!%p4149_p12)
}
  0x94   : > { %s5875_s10 = scalar_lea.sflag [#allocation13], %s4910_s18  ;;  %s5876_s20 = sld [smem:[#allocation60_spill]] }
  0x95   : > { %3895 = dma.hbm_to_vmem [thread:$0]  (!%p5873_p13), %s4923_s0, 16, %s4925_s25, %s5875_s10  }
  0x96   : > { %s891_s23 = scalar_lea.vmem [#allocation15], %s4913_s19 }
  0x97   : > { %s898_s24 = sshll.u32 %s891_s23, 4  ;;  %s899_s24 = int_to_ptr.vmem [resolvable:$true] %s898_s24 }
  0x9a   : > { %s4961_s21 = scalar_lea.hbm %s5876_s20, %s4916_s14  ;;  %s4158_s0 = scalar_lea.hbm %s5876_s20, 32 }
  0x9b   : > { %s4153_s6 = scalar_lea.hbm %s4961_s21, 16  ;;  %p4159_p3 = scmp.lt.u32.totalorder %s4961_s21, %s5876_s20 }
  0x9c   : > { %p4154_p11 = scmp.ne.s32.totalorder %s4961_s21, %s4153_s6  ;;  %p4160_p4 = scmp.lt.u32.totalorder %s4158_s0, %s4153_s6 }
  0x9d   : > { %p4162_p6 = scmp.lt.u32.totalorder %s4153_s6, %s4961_s21 }
  0x9e   : > { %p4156_p2 = pnand %p4154_p11, %p4932_p0  ;;  %p4161_p5 = por %p4160_p4, %p4159_p3 }
  0xa0   : > { %p4157_p7 = pneg %p4156_p2  ;;  %p4163_p9 = por %p4162_p6, %p4161_p5 }
  0xa2   : > { %p4164_p10 = pnand %p4163_p9, %p4157_p7 }
  0xa4   : > { %4167 = shalt.err (!%p4164_p10)
}
  0xa5   : > { %s4168_s29 = scalar_lea.vmem %s899_s24, 16  ;;  %s4606_s23 = smov [#allocation15]  }
  0xa6   : > { %p4169_p1 = scmp.ne.s32.totalorder %s899_s24, %s4168_s29  ;;  %s4173_s3 = sshll.u32 %s4606_s23, 4  ;;  %s4174_s3 = int_to_ptr.vmem [resolvable:$false] %s4173_s3 }
  0xa7   : > { %s4175_s17 = scalar_lea.vmem %s4174_s3, 32  ;;  %p4176_p11 = scmp.lt.s32.totalorder %s899_s24, %s4174_s3 }
  0xa8   : > { %p4171_p8 = pnand %p4169_p1, %p4932_p0  ;;  %p4177_p2 = scmp.lt.s32.totalorder %s4175_s17, %s4168_s29 }
  0xaa   : > { %p4172_p12 = pneg %p4171_p8  ;;  %p4178_p13 = por %p4177_p2, %p4176_p11 }
  0xac   : > { %p4179_p3 = pnand %p4178_p13, %p4172_p12 }
  0xae   : > { %4182 = shalt.err (!%p4179_p3)
}
  0xaf   : > { %p5877_p4 = scmp.ne.s32.totalorder %s5867_s22, 0  ;;  %s5878_s6 = scalar_lea.sflag [#allocation16], %s4910_s18 }
  0xb0   : > { %s5879_s12 = sld [smem:[#allocation62_spill]]  ;;  %s925_s3 = scalar_lea.vmem [#allocation18], %s4913_s19 }
  0xb1   : > { %3901 = dma.hbm_to_vmem [thread:$0]  (!%p5877_p4), %s4961_s21, 16, %s899_s24, %s5878_s6  }
  0xb2   : > { %s932_s26 = sshll.u32 %s925_s3, 4  ;;  %s933_s26 = int_to_ptr.vmem [resolvable:$true] %s932_s26 }
  0xb6   : > { %s4988_s10 = scalar_lea.hbm %s5879_s12, %s4916_s14  ;;  %s4188_s24 = scalar_lea.hbm %s5879_s12, 32 }
  0xb7   : > { %s4183_s23 = scalar_lea.hbm %s4988_s10, 16  ;;  %p4189_p6 = scmp.lt.u32.totalorder %s4988_s10, %s5879_s12 }
  0xb8   : > { %p4184_p13 = scmp.ne.s32.totalorder %s4988_s10, %s4183_s23  ;;  %p4190_p9 = scmp.lt.u32.totalorder %s4188_s24, %s4183_s23 }
  0xb9   : > { %p4192_p1 = scmp.lt.u32.totalorder %s4183_s23, %s4988_s10 }
  0xba   : > { %p4186_p7 = pnand %p4184_p13, %p4932_p0  ;;  %p4191_p10 = por %p4190_p9, %p4189_p6 }
  0xbc   : > { %p4187_p5 = pneg %p4186_p7  ;;  %p4193_p8 = por %p4192_p1, %p4191_p10 }
  0xbe   : > { %p4194_p12 = pnand %p4193_p8, %p4187_p5 }
  0xc0   : > { %4197 = shalt.err (!%p4194_p12)
}
  0xc1   : > { %s4198_s0 = scalar_lea.vmem %s933_s26, 16  ;;  %s4607_s3 = smov [#allocation18]  }
  0xc2   : > { %p4199_p11 = scmp.ne.s32.totalorder %s933_s26, %s4198_s0  ;;  %s4203_s29 = sshll.u32 %s4607_s3, 4  ;;  %s4204_s29 = int_to_ptr.vmem [resolvable:$false] %s4203_s29 }
  0xc3   : > { %s4205_s17 = scalar_lea.vmem %s4204_s29, 32  ;;  %p4206_p13 = scmp.lt.s32.totalorder %s933_s26, %s4204_s29 }
  0xc4   : > { %p4201_p2 = pnand %p4199_p11, %p4932_p0  ;;  %p4207_p7 = scmp.lt.s32.totalorder %s4205_s17, %s4198_s0 }
  0xc6   : > { %p4202_p3 = pneg %p4201_p2  ;;  %p4208_p4 = por %p4207_p7, %p4206_p13 }
  0xc8   : > { %p4209_p6 = pnand %p4208_p4, %p4202_p3 }
  0xca   : > { %4212 = shalt.err (!%p4209_p6)
}
  0xcb   : > { %p5880_p9 = scmp.ne.s32.totalorder %s5867_s22, 0  ;;  %s5881_s23 = scalar_lea.sflag [#allocation19], %s4910_s18 }
  0xcc   : > { %s5882_s15 = sld [smem:[#allocation65_spill]]  ;;  %s967_s29 = scalar_lea.vmem [#allocation21], %s4913_s19 }
  0xcd   : > { %3907 = dma.hbm_to_vmem [thread:$0]  (!%p5880_p9), %s4988_s10, 16, %s933_s26, %s5881_s23  }
  0xce   : > { %s974_s25 = sshll.u32 %s967_s29, 4  ;;  %s975_s25 = int_to_ptr.vmem [resolvable:$true] %s974_s25 }
  0xd2   : > { %s5015_s6 = scalar_lea.hbm %s5882_s15, %s4916_s14  ;;  %s4218_s26 = scalar_lea.hbm %s5882_s15, 32 }
  0xd3   : > { %s4213_s3 = scalar_lea.hbm %s5015_s6, 16  ;;  %p4219_p1 = scmp.lt.u32.totalorder %s5015_s6, %s5882_s15 }
  0xd4   : > { %p4214_p4 = scmp.ne.s32.totalorder %s5015_s6, %s4213_s3  ;;  %p4220_p8 = scmp.lt.u32.totalorder %s4218_s26, %s4213_s3 }
  0xd5   : > { %p4222_p11 = scmp.lt.u32.totalorder %s4213_s3, %s5015_s6 }
  0xd6   : > { %p4216_p5 = pnand %p4214_p4, %p4932_p0  ;;  %p4221_p12 = por %p4220_p8, %p4219_p1 }
  0xd8   : > { %p4217_p10 = pneg %p4216_p5  ;;  %p4223_p2 = por %p4222_p11, %p4221_p12 }
  0xda   : > { %p4224_p3 = pnand %p4223_p2, %p4217_p10 }
  0xdc   : > { %4227 = shalt.err (!%p4224_p3)
}
  0xdd   : > { %s4228_s24 = scalar_lea.vmem %s975_s25, 16  ;;  %s4608_s29 = smov [#allocation21]  }
  0xde   : > { %p4229_p13 = scmp.ne.s32.totalorder %s975_s25, %s4228_s24  ;;  %s4233_s0 = sshll.u32 %s4608_s29, 4  ;;  %s4234_s0 = int_to_ptr.vmem [resolvable:$false] %s4233_s0 }
  0xdf   : > { %s4235_s17 = scalar_lea.vmem %s4234_s0, 32  ;;  %p4236_p4 = scmp.lt.s32.totalorder %s975_s25, %s4234_s0 }
  0xe0   : > { %p4231_p7 = pnand %p4229_p13, %p4932_p0  ;;  %p4237_p5 = scmp.lt.s32.totalorder %s4235_s17, %s4228_s24 }
  0xe2   : > { %p4232_p6 = pneg %p4231_p7  ;;  %p4238_p9 = por %p4237_p5, %p4236_p4 }
  0xe4   : > { %p4239_p1 = pnand %p4238_p9, %p4232_p6 }
  0xe6   : > { %4242 = shalt.err (!%p4239_p1)
}
  0xe7   : > { %p5883_p8 = scmp.ne.s32.totalorder %s5867_s22, 0  ;;  %s5884_s3 = scalar_lea.sflag [#allocation22], %s4910_s18 }
  0xe8   : > { %s4609_s10 = smov [#allocation11]   ;;  %s5885_s29 = sld [smem:[#allocation54_spill]] }
  0xe9   : > { %3913 = dma.hbm_to_vmem [thread:$0]  (!%p5883_p8), %s5015_s6, 16, %s975_s25, %s5884_s3  }
  0xea   : > { %s767_s26 = sshll.u32 %s4609_s10, 4  ;;  %p5887_p9 = scmp.ne.s32.totalorder %s5869_s16, 0  ;;  %s768_s26 = int_to_ptr.vmem [resolvable:$true] %s767_s26 }
  0xee   : > { %s5886_s12 = smov %s5885_s29  ;;  %s4243_s15 = scalar_lea.hbm %s5885_s29, 16 }
  0xef   : > { %p4244_p10 = scmp.ne.s32.totalorder %s5886_s12, %s4243_s15  ;;  %p4250_p2 = scmp.lt.u32.totalorder %s4243_s15, %s5886_s12 }
  0xf1   : > { %p4246_p12 = pnand %p4244_p10, %p5887_p9 }
  0xf3   : > { %p4247_p11 = pneg %p4246_p12 }
  0xf5   : > { %p4252_p3 = pnand %p4250_p2, %p4247_p11 }
  0xf7   : > { %4255 = shalt.err (!%p4252_p3)
}
  0xf8   : > { %s4256_s6 = scalar_lea.vmem %s768_s26, 16  ;;  %s4263_s25 = scalar_lea.vmem %s768_s26, 32 }
  0xf9   : > { %p4257_p13 = scmp.ne.s32.totalorder %s768_s26, %s4256_s6  ;;  %p4264_p4 = scmp.lt.s32.totalorder %s768_s26, %s768_s26 }
  0xfa   : > { %p4265_p5 = scmp.lt.s32.totalorder %s4263_s25, %s4256_s6 }
  0xfb   : > { %p4259_p7 = pnand %p4257_p13, %p5887_p9 }
  0xfc   : > { %p4266_p1 = por %p4265_p5, %p4264_p4 }
  0xfd   : > { %p4260_p6 = pneg %p4259_p7 }
  0xff   : > { %p4267_p8 = pnand %p4266_p1, %p4260_p6 }
 0x101   : > { %4270 = shalt.err (!%p4267_p8)
}
 0x102   : > { %p5888_p10 = scmp.ne.s32.totalorder %s5866_s27, 0  ;;  %s3557_s15 = sadd.s32 4294967294, %s4601_s2  }
 0x103   : > { %s67_s16 = sadd.s32 1, %s4593_s9  ;;  %s70_s27 = sadd.s32 1, %s4597_s30 }
 0x104   : > { %3885 = dma.hbm_to_vmem [thread:$0]  (!%p5888_p10), %s5886_s12, 16, %s768_s26, [#allocation10]  }
 0x105   : > { %p68_p8 = scmp.ge.s32.totalorder %s67_s16, 2  ;;  %s77_s10 = sadd.s32 1, %s4581_s4 }
 0x106   : > { %p84_p9 = scmp.ne.s32.totalorder %s4581_s4, %s4577_s8  ;;  %p5890_p12 = scmp.eq.s32.totalorder %s4601_s2, 0 }
 0x107   : > { %s5971_s16 = smov (%p68_p8, %s67_s16), 0  ;;  %s5973_s27 = smov (!%p68_p8, %s70_s27), %s4597_s30 }
 0x108   : > { %5889 = sst [smem:[#allocation45_spill]] %s5971_s16  ;;  %p5070_p11 = por %p5890_p12, %p84_p9 }
 0x109   : > { %p90_p2 = scmp.ne.s32.totalorder %s4577_s8, %s4573_s28  ;;  %p72_p3 = scmp.ge.s32.totalorder %s5973_s27, 2 }
 0x10a   : > { %s241_s23 = ssub.s32 %s4593_s9, %s5971_s16  ;;  %p5892_p13 = scmp.eq.s32.totalorder %s4823_s5, 0 }
 0x10b   : > { %p242_p6 = scmp.eq.s32.totalorder %s241_s23, 0  ;;  %s5975_s27 = smov (%p72_p3, %s5973_s27), 0 }
 0x10c   : > { %p5083_p7 = por %p5892_p13, %p90_p2  ;;  %5894 = sst [smem:[#allocation46_spill]] %s5975_s27 }
 0x10d   : > { %s244_s29 = sadd.s32 1, %s4569_s7  ;;  %p719_p4 = scmp.eq.s32.totalorder %s4823_s5, 3 }
 0x10e   : > { %s5893_s21 = scalar_select %p5083_p7, 1, 0 }
 0x10f   : > { %s74_s0 = ssub.s32 %s4597_s30, %s5975_s27  ;;  %p725_p5 = scmp.eq.s32.totalorder %s3557_s15, 3 }
 0x110   : > { %p75_p1 = scmp.eq.s32.totalorder %s74_s0, 0  ;;  %p5096_p10 = por %p719_p4, %p84_p9 }
 0x111   : > { %s5101_s17 = scalar_select %p242_p6, %s4569_s7, %s244_s29  }
 0x112   : > { %s5895_s24 = scalar_select %p5096_p10, 1, 0 }
 0x113   : > { %5896 = sst [smem:[#allocation47_spill]] %s5101_s17  ;;  %p5109_p8 = por %p725_p5, %p90_p2 }
 0x114   : > { %s5104_s6 = scalar_select %p75_p1, %s4581_s4, %s77_s10  }
 0x115   : > { %s5898_s25 = scalar_select %p5109_p8, 1, 0 }
 0x116   : > { %5897 = sst [smem:[#allocation48_spill]] %s5104_s6  ;;  %s796_s20 = sand.u32 1, %s4581_s4  }
 0x117   : > { %5899 = sst [smem:[#allocation49_spill]] %s5898_s25  ;;  %s5114_s3 = sshll.u32 %s796_s20, 3 }
 0x118   : > { %s3564_s15 = sshll.u32 %s4597_s30, 7  ;;  %s5900_s12 = sld [smem:[#allocation50_spill]] }
 0x119   : > { %s800_s10 = scalar_lea.vmem [#allocation3], %s5114_s3  ;;  %p5901_p9 = scmp.lt.s32.totalorder %s4601_s2, 4 }
 0x11a   : > { %s807_s29 = sshll.u32 %s800_s10, 4  ;;  %s5903_s6 = sld [smem:[#allocation51_spill]]  ;;  %s5123_s29 = int_to_ptr.vmem [resolvable:$true] %s807_s29 }
 0x11b   : > { %p5129_p12 = pnand %p5901_p9, %p5070_p11  ;;  %s797_s0 = scalar_lea.sflag [#allocation4], %s796_s20 }
 0x11d   : > { %p4273_p3 = pneg %p5129_p12 }
 0x11e   : > { %s5120_s27 = scalar_lea.hbm %s5900_s12, %s3564_s15  ;;  %s4276_s17 = scalar_lea.hbm %s5900_s12, 256 }
 0x11f   : > { %s4271_s4 = scalar_lea.hbm %s5120_s27, 128  ;;  %p4277_p11 = scmp.lt.u32.totalorder %s5120_s27, %s5900_s12 }
 0x120   : > { %s5136_s23 = scalar_lea.hbm %s5903_s6, %s3564_s15  ;;  %p4272_p2 = scmp.ne.s32.totalorder %s5120_s27, %s4271_s4 }
 0x121   : > { %p4278_p4 = scmp.lt.u32.totalorder %s4276_s17, %s4271_s4  ;;  %p4280_p1 = scmp.lt.u32.totalorder %s4271_s4, %s5120_s27 }
 0x122   : > { %p4274_p13 = pnand %p4273_p3, %p4272_p2 }
 0x123   : > { %p4279_p5 = por %p4278_p4, %p4277_p11 }
 0x124   : > { %p4275_p6 = pneg %p4274_p13 }
 0x125   : > { %p4281_p9 = por %p4280_p1, %p4279_p5 }
 0x127   : > { %p4282_p8 = pnand %p4281_p9, %p4275_p6 }
 0x129   : > { %4285 = shalt.err (!%p4282_p8)
}
 0x12a   : > { %s4286_s9 = scalar_lea.vmem %s5123_s29, 128  ;;  %s4610_s30 = smov [#allocation3]  }
 0x12b   : > { %p4287_p2 = scmp.ne.s32.totalorder %s5123_s29, %s4286_s9  ;;  %s4291_s20 = sshll.u32 %s4610_s30, 4  ;;  %s4292_s20 = int_to_ptr.vmem [resolvable:$false] %s4291_s20 }
 0x12c   : > { %s4293_s7 = scalar_lea.vmem %s4292_s20, 256  ;;  %p4294_p7 = scmp.lt.s32.totalorder %s5123_s29, %s4292_s20 }
 0x12d   : > { %p4289_p13 = pnand %p4287_p2, %p4273_p3  ;;  %p4295_p11 = scmp.lt.s32.totalorder %s4293_s7, %s4286_s9 }
 0x12f   : > { %p4290_p10 = pneg %p4289_p13  ;;  %p4296_p4 = por %p4295_p11, %p4294_p7 }
 0x131   : > { %p4297_p5 = pnand %p4296_p4, %p4290_p10 }
 0x133   : > { %4300 = shalt.err (!%p4297_p5)
}
 0x134   : > { %3889 = dma.hbm_to_vmem [thread:$0]  (!%p5129_p12), %s5120_s27, 128, %s5123_s29, %s797_s0  }
 0x135   : > { %s818_s4 = scalar_lea.vmem [#allocation6], %s5114_s3  ;;  %s5904_s26 = sld [smem:[#allocation59_spill]] }
 0x136   : > { %s825_s17 = sshll.u32 %s818_s4, 4  ;;  %s815_s9 = scalar_lea.sflag [#allocation7], %s4910_s18  ;;  %s5164_s17 = int_to_ptr.vmem [resolvable:$true] %s825_s17 }
 0x137   : > { %s4301_s30 = scalar_lea.hbm %s5136_s23, 128  ;;  %s4306_s27 = scalar_lea.hbm %s5903_s6, 256 }
 0x138   : > { %p4302_p7 = scmp.ne.s32.totalorder %s5136_s23, %s4301_s30  ;;  %p4307_p6 = scmp.lt.u32.totalorder %s5136_s23, %s5903_s6 }
 0x139   : > { %p4308_p1 = scmp.lt.u32.totalorder %s4306_s27, %s4301_s30  ;;  %p4310_p2 = scmp.lt.u32.totalorder %s4301_s30, %s5136_s23 }
 0x13a   : > { %p4304_p10 = pnand %p4302_p7, %p4273_p3 }
 0x13b   : > { %s5170_s10 = scalar_lea.hbm %s5904_s26, %s4916_s14  ;;  %p4309_p9 = por %p4308_p1, %p4307_p6 }
 0x13c   : > { %p4305_p8 = pneg %p4304_p10 }
 0x13d   : > { %p4311_p13 = por %p4310_p2, %p4309_p9 }
 0x13f   : > { %p4312_p11 = pnand %p4311_p13, %p4305_p8 }
 0x141   : > { %4315 = shalt.err (!%p4312_p11)
}
 0x142   : > { %s4316_s0 = scalar_lea.vmem %s5164_s17, 128  ;;  %s4611_s4 = smov [#allocation6]  }
 0x143   : > { %p4317_p4 = scmp.ne.s32.totalorder %s5164_s17, %s4316_s0  ;;  %s4321_s25 = sshll.u32 %s4611_s4, 4  ;;  %s4322_s25 = int_to_ptr.vmem [resolvable:$false] %s4321_s25 }
 0x144   : > { %s4323_s15 = scalar_lea.vmem %s4322_s25, 256  ;;  %p4324_p10 = scmp.lt.s32.totalorder %s5164_s17, %s4322_s25 }
 0x145   : > { %p4319_p5 = pnand %p4317_p4, %p4273_p3  ;;  %p4325_p6 = scmp.lt.s32.totalorder %s4323_s15, %s4316_s0 }
 0x147   : > { %p4320_p7 = pneg %p4319_p5  ;;  %p4326_p1 = por %p4325_p6, %p4324_p10 }
 0x149   : > { %p4327_p9 = pnand %p4326_p1, %p4320_p7 }
 0x14b   : > { %4330 = shalt.err (!%p4327_p9)
}
 0x14c   : > { %3892 = dma.hbm_to_vmem [thread:$0]  (!%p5129_p12), %s5136_s23, 128, %s5164_s17, %s815_s9  }
 0x14d   : > { %s874_s30 = scalar_lea.vmem [#allocation14], %s4913_s19  ;;  %s5905_s11 = sld [smem:[#allocation61_spill]] }
 0x14e   : > { %s881_s20 = sshll.u32 %s874_s30, 4  ;;  %s4331_s29 = scalar_lea.hbm %s5170_s10, 16  ;;  %s882_s20 = int_to_ptr.vmem [resolvable:$true] %s881_s20 }
 0x14f   : > { %p4332_p3 = scmp.ne.s32.totalorder %s5170_s10, %s4331_s29  ;;  %s4336_s4 = scalar_lea.hbm %s5904_s26, 32 }
 0x150   : > { %p4337_p12 = scmp.lt.u32.totalorder %s5170_s10, %s5904_s26  ;;  %p4338_p13 = scmp.lt.u32.totalorder %s4336_s4, %s4331_s29 }
 0x151   : > { %p4334_p8 = pnand %p4332_p3, %p4932_p0  ;;  %p4340_p4 = scmp.lt.u32.totalorder %s4331_s29, %s5170_s10 }
 0x152   : > { %p4339_p11 = por %p4338_p13, %p4337_p12 }
 0x153   : > { %s5201_s3 = scalar_lea.hbm %s5905_s11, %s4916_s14  ;;  %p4335_p2 = pneg %p4334_p8 }
 0x154   : > { %p4341_p5 = por %p4340_p4, %p4339_p11 }
 0x156   : > { %p4342_p7 = pnand %p4341_p5, %p4335_p2 }
 0x158   : > { %4345 = shalt.err (!%p4342_p7)
}
 0x159   : > { %s4346_s23 = scalar_lea.vmem %s882_s20, 16  ;;  %s4612_s17 = smov [#allocation14]  }
 0x15a   : > { %p4347_p10 = scmp.ne.s32.totalorder %s882_s20, %s4346_s23  ;;  %s4351_s9 = sshll.u32 %s4612_s17, 4  ;;  %s4352_s9 = int_to_ptr.vmem [resolvable:$false] %s4351_s9 }
 0x15b   : > { %s4353_s30 = scalar_lea.vmem %s4352_s9, 32  ;;  %p4354_p9 = scmp.lt.s32.totalorder %s882_s20, %s4352_s9 }
 0x15c   : > { %p4349_p6 = pnand %p4347_p10, %p4932_p0  ;;  %p4355_p3 = scmp.lt.s32.totalorder %s4353_s30, %s4346_s23 }
 0x15e   : > { %p4350_p1 = pneg %p4349_p6  ;;  %p4356_p8 = por %p4355_p3, %p4354_p9 }
 0x160   : > { %p4357_p12 = pnand %p4356_p8, %p4350_p1 }
 0x162   : > { %4360 = shalt.err (!%p4357_p12)
}
 0x163   : > { %p5906_p13 = scmp.ne.s32.totalorder %s5867_s22, 0  ;;  %s5907_s7 = scalar_lea.sflag [#allocation13], %s4910_s18 }
 0x164   : > { %s908_s27 = scalar_lea.vmem [#allocation17], %s4913_s19  ;;  %s5908_s13 = sld [smem:[#allocation63_spill]] }
 0x165   : > { %3898 = dma.hbm_to_vmem [thread:$0]  (!%p5906_p13), %s5170_s10, 16, %s882_s20, %s5907_s7  }
 0x166   : > { %s915_s29 = sshll.u32 %s908_s27, 4  ;;  %s4361_s25 = scalar_lea.hbm %s5201_s3, 16  ;;  %s916_s29 = int_to_ptr.vmem [resolvable:$true] %s915_s29 }
 0x167   : > { %p4362_p2 = scmp.ne.s32.totalorder %s5201_s3, %s4361_s25  ;;  %s4366_s17 = scalar_lea.hbm %s5905_s11, 32 }
 0x168   : > { %p4367_p5 = scmp.lt.u32.totalorder %s5201_s3, %s5905_s11  ;;  %p4368_p7 = scmp.lt.u32.totalorder %s4366_s17, %s4361_s25 }
 0x169   : > { %p4364_p11 = pnand %p4362_p2, %p4932_p0  ;;  %p4370_p6 = scmp.lt.u32.totalorder %s4361_s25, %s5201_s3 }
 0x16a   : > { %s5227_s4 = scalar_lea.hbm %s5908_s13, %s4916_s14  ;;  %p4369_p10 = por %p4368_p7, %p4367_p5 }
 0x16b   : > { %p4365_p4 = pneg %p4364_p11 }
 0x16c   : > { %p4371_p1 = por %p4370_p6, %p4369_p10 }
 0x16e   : > { %p4372_p9 = pnand %p4371_p1, %p4365_p4 }
 0x170   : > { %4375 = shalt.err (!%p4372_p9)
}
 0x171   : > { %s4376_s10 = scalar_lea.vmem %s916_s29, 16  ;;  %s4613_s20 = smov [#allocation17]  }
 0x172   : > { %p4377_p3 = scmp.ne.s32.totalorder %s916_s29, %s4376_s10  ;;  %s4381_s7 = sshll.u32 %s4613_s20, 4  ;;  %s4382_s7 = int_to_ptr.vmem [resolvable:$false] %s4381_s7 }
 0x173   : > { %s4383_s27 = scalar_lea.vmem %s4382_s7, 32  ;;  %p4384_p2 = scmp.lt.s32.totalorder %s916_s29, %s4382_s7 }
 0x174   : > { %p4379_p8 = pnand %p4377_p3, %p4932_p0  ;;  %p4385_p11 = scmp.lt.s32.totalorder %s4383_s27, %s4376_s10 }
 0x176   : > { %p4380_p12 = pneg %p4379_p8  ;;  %p4386_p13 = por %p4385_p11, %p4384_p2 }
 0x178   : > { %p4387_p5 = pnand %p4386_p13, %p4380_p12 }
 0x17a   : > { %4390 = shalt.err (!%p4387_p5)
}
 0x17b   : > { %p5909_p7 = scmp.ne.s32.totalorder %s5867_s22, 0  ;;  %s5910_s16 = scalar_lea.sflag [#allocation16], %s4910_s18 }
 0x17c   : > { %s942_s0 = scalar_lea.vmem [#allocation20], %s4913_s19  ;;  %s5911_s17 = sld [smem:[#allocation67_spill]] }
 0x17d   : > { %3904 = dma.hbm_to_vmem [thread:$0]  (!%p5909_p7), %s5201_s3, 16, %s916_s29, %s5910_s16  }
 0x17e   : > { %s949_s25 = sshll.u32 %s942_s0, 4  ;;  %s4391_s30 = scalar_lea.hbm %s5227_s4, 16  ;;  %s950_s25 = int_to_ptr.vmem [resolvable:$true] %s949_s25 }
 0x17f   : > { %p4392_p13 = scmp.ne.s32.totalorder %s5227_s4, %s4391_s30  ;;  %s4396_s7 = scalar_lea.hbm %s5908_s13, 32 }
 0x180   : > { %p4397_p6 = scmp.lt.u32.totalorder %s5227_s4, %s5908_s13  ;;  %p4398_p1 = scmp.lt.u32.totalorder %s4396_s7, %s4391_s30 }
 0x181   : > { %p4394_p4 = pnand %p4392_p13, %p4932_p0  ;;  %p4400_p3 = scmp.lt.u32.totalorder %s4391_s30, %s5227_s4 }
 0x182   : > { %s5253_s9 = scalar_lea.hbm %s5911_s17, %s4916_s14  ;;  %p4399_p9 = por %p4398_p1, %p4397_p6 }
 0x183   : > { %p4395_p10 = pneg %p4394_p4 }
 0x184   : > { %p4401_p8 = por %p4400_p3, %p4399_p9 }
 0x186   : > { %p4402_p12 = pnand %p4401_p8, %p4395_p10 }
 0x188   : > { %4405 = shalt.err (!%p4402_p12)
}
 0x189   : > { %s4406_s14 = scalar_lea.vmem %s950_s25, 16  ;;  %s4614_s3 = smov [#allocation20]  }
 0x18a   : > { %p4407_p2 = scmp.ne.s32.totalorder %s950_s25, %s4406_s14  ;;  %s4411_s29 = sshll.u32 %s4614_s3, 4  ;;  %s4412_s29 = int_to_ptr.vmem [resolvable:$false] %s4411_s29 }
 0x18b   : > { %s4413_s16 = scalar_lea.vmem %s4412_s29, 32  ;;  %p4414_p13 = scmp.lt.s32.totalorder %s950_s25, %s4412_s29 }
 0x18c   : > { %p4409_p11 = pnand %p4407_p2, %p4932_p0  ;;  %p4415_p4 = scmp.lt.s32.totalorder %s4413_s16, %s4406_s14 }
 0x18e   : > { %p4410_p5 = pneg %p4409_p11  ;;  %p4416_p7 = por %p4415_p4, %p4414_p13 }
 0x190   : > { %p4417_p1 = pnand %p4416_p7, %p4410_p5 }
 0x192   : > { %4420 = shalt.err (!%p4417_p1)
}
 0x193   : > { %p5912_p6 = scmp.ne.s32.totalorder %s5867_s22, 0  ;;  %s5913_s6 = scalar_lea.sflag [#allocation19], %s4910_s18 }
 0x194   : > { %s992_s0 = scalar_lea.vmem [#allocation23], %s4913_s19  ;;  %s4421_s23 = scalar_lea.hbm %s5253_s9, 16 }
 0x195   : > { %3910 = dma.hbm_to_vmem [thread:$0]  (!%p5912_p6), %s5227_s4, 16, %s950_s25, %s5913_s6  }
 0x196   : > { %s999_s15 = sshll.u32 %s992_s0, 4  ;;  %p4422_p10 = scmp.ne.s32.totalorder %s5253_s9, %s4421_s23  ;;  %s1000_s15 = int_to_ptr.vmem [resolvable:$true] %s999_s15 }
 0x197   : > { %s4426_s20 = scalar_lea.hbm %s5911_s17, 32  ;;  %p4427_p3 = scmp.lt.u32.totalorder %s5253_s9, %s5911_s17 }
 0x198   : > { %p4424_p7 = pnand %p4422_p10, %p4932_p0  ;;  %p4428_p8 = scmp.lt.u32.totalorder %s4426_s20, %s4421_s23 }
 0x199   : > { %p4430_p2 = scmp.lt.u32.totalorder %s4421_s23, %s5253_s9 }
 0x19a   : > { %p4425_p9 = pneg %p4424_p7  ;;  %p4429_p12 = por %p4428_p8, %p4427_p3 }
 0x19c   : > { %p4431_p11 = por %p4430_p2, %p4429_p12 }
 0x19e   : > { %p4432_p5 = pnand %p4431_p11, %p4425_p9 }
 0x1a0   : > { %4435 = shalt.err (!%p4432_p5)
}
 0x1a1   : > { %s4436_s19 = scalar_lea.vmem %s1000_s15, 16  ;;  %s4615_s4 = smov [#allocation23]  }
 0x1a2   : > { %p4437_p13 = scmp.ne.s32.totalorder %s1000_s15, %s4436_s19  ;;  %s4441_s25 = sshll.u32 %s4615_s4, 4  ;;  %s4442_s25 = int_to_ptr.vmem [resolvable:$false] %s4441_s25 }
 0x1a3   : > { %s4443_s14 = scalar_lea.vmem %s4442_s25, 32  ;;  %p4444_p10 = scmp.lt.s32.totalorder %s1000_s15, %s4442_s25 }
 0x1a4   : > { %p4439_p4 = pnand %p4437_p13, %p4932_p0  ;;  %p4445_p7 = scmp.lt.s32.totalorder %s4443_s14, %s4436_s19 }
 0x1a6   : > { %p4440_p1 = pneg %p4439_p4  ;;  %p4446_p6 = por %p4445_p7, %p4444_p10 }
 0x1a8   : > { %p4447_p3 = pnand %p4446_p6, %p4440_p1 }
 0x1aa   : > { %4450 = shalt.err (!%p4447_p3)
}
 0x1ab   : > { %p5914_p8 = scmp.ne.s32.totalorder %s5867_s22, 0  ;;  %s5915_s3 = scalar_lea.sflag [#allocation22], %s4910_s18 }
 0x1ac   : > { %s5916_s29 = sld [smem:[#allocation44_spill]] }
 0x1ad   : > { %3916 = dma.hbm_to_vmem [thread:$0]  (!%p5914_p8), %s5253_s9, 16, %s1000_s15, %s5915_s3  }
 0x1b2   : > { %p5917_p9 = scmp.ne.s32.totalorder %s5916_s29, 0 }
 0x1b3   : > { %s5297_s1 = sand.u32 (!%p5917_p9), 1, %s4577_s8   ;;  %p5918_p0 = scmp.ne.s32.totalorder (!%p5917_p9), %s5893_s21, 0 }
 0x1b4   : > { %1020 = sbr.rel (%p5917_p9) target bundleno = 4569 (0x11d9), region = 124  ;;  %s3576_s16 = sshll.u32 (!%p5917_p9), %s5297_s1, 3 }
 0x1b5   : > { %s1023_s6 = scalar_lea.sflag (!%p5917_p9), [#allocation4], %s5297_s1  ;;  %s5301_s0 = scalar_lea.vmem (!%p5917_p9), [#allocation3], %s3576_s16 }
 0x1bb   : > { %4524 = dma.done.wait (%p5918_p0), %s1023_s6, 128  }
 0x1bc   : > { %4526 = vsyncadd (%p5918_p0), %s1023_s6, 4294967168  ;;  %s1031_s22 = sand.u32 1, %s4823_s5   ;;  %s5308_s9 = scalar_lea.vmem [#allocation6], %s3576_s16 }
 0x1bd   : > { %s1032_s18 = scalar_lea.sflag [#allocation7], %s1031_s22 }
 0x1be   : > { %4528 = dma.done.wait (%p5918_p0), %s1032_s18, 128  }
 0x1bf   : > { %4530 = vsyncadd (%p5918_p0), %s1032_s18, 4294967168  ;;  %p5919_p6 = scmp.eq.s32.totalorder %s4823_s5, 0 }
 0x1c1   : > { %4532 = dma.done.wait (%p5919_p6), [#allocation7], 128   ;;  %p5920_p12 = pmov %p5919_p6 }
 0x1c2   : > { %p5921_p2 = pmov %p5919_p6 }
 0x1c3   : > { %4534 = vsyncadd (%p5920_p12), [#allocation7], 4294967168 }
 0x1c4   : > { %4536 = dma.done.wait (%p5921_p2), [#allocation10], 32   ;;  %p5922_p11 = pmov %p5921_p2 }
 0x1c5   : > { %s5923_s15 = sld [smem:[#allocation34_spill]]  ;;  %s5924_s23 = sld [smem:[#allocation43_spill]] }
 0x1c6   : > { %4538 = vsyncadd (%p5922_p11), [#allocation10], 4294967264  ;;  %s1053_s10 = scalar_lea.sflag [#allocation13], %s1031_s22 }
 0x1cb   : > { %s5323_s30 = sand.u32 1, %s5923_s15   ;;  %p5925_p5 = scmp.ne.s32.totalorder %s5924_s23, 0 }
 0x1cd   : > { %4540 = dma.done.wait (%p5925_p5), %s1053_s10, 32  }
 0x1ce   : > { %4542 = vsyncadd (%p5925_p5), %s1053_s10, 4294967264  ;;  %s1069_s7 = scalar_lea.sflag [#allocation16], %s1031_s22 }
 0x1cf   : > { %4544 = dma.done.wait (%p5925_p5), %s1069_s7, 32  }
 0x1d0   : > { %4546 = vsyncadd (%p5925_p5), %s1069_s7, 4294967264  ;;  %s1085_s19 = scalar_lea.sflag [#allocation19], %s1031_s22 }
 0x1d1   : > { %4548 = dma.done.wait (%p5925_p5), %s1085_s19, 32  }
 0x1d2   : > { %4550 = vsyncadd (%p5925_p5), %s1085_s19, 4294967264  ;;  %s1101_s14 = scalar_lea.sflag [#allocation22], %s1031_s22 }
 0x1d3   : > { %4552 = dma.done.wait (%p5925_p5), %s1101_s14, 32  }
 0x1d4   : > { %4554 = vsyncadd (%p5925_p5), %s1101_s14, 4294967264  ;;  %s5926_s29 = sld [smem:[#allocation40_spill]]  ;;  %s5927_s16 = sld [smem:[#allocation39_spill]] }
 0x1d5   : > { %s5929_s3 = sld [smem:[#allocation56_spill]]  ;;  %s5930_s27 = sld [smem:[#allocation58_spill]] }
 0x1d6   : > { %s5931_s22 = sld [smem:[#allocation64_spill]]  ;;  %s5932_s15 = sld [smem:[#allocation66_spill]] }
 0x1d7   : > { %s5933_s19 = sld [smem:[#allocation68_spill]]  ;;  %s5934_s28 = sld [smem:[#allocation69_spill]] }
 0x1d8   : > { %s1244_s4 = scalar_lea.vmem [#allocation24], %s5297_s1 }
 0x1da   : > { %p1245_p13 = scmp.lt.s32.totalorder %s5926_s29, 1  ;;  %p1248_p4 = scmp.lt.s32.totalorder %s5927_s16, 1 }
 0x1db   : > { %p3589_p1 = scmp.ne.s32.totalorder %s5927_s16, 0 }
 0x1dc   : > { %s5977_s29 = smov (!%p1245_p13, %s5926_s29), 1  ;;  %v1278_v0 = vld [vmem:[%s5301_s0] sm:$0xff] (!%p3589_p1)  ;;  %v1279_v1 = vld [vmem:[%s5308_s9] sm:$0xff] (!%p3589_p1)  ;;  %vm1285_vm0 = vcmask (!%p3589_p1), 261120  }
 0x1dd   : > { %s5354_s6 = scalar_select %p1248_p4, %s5927_s16, 1 }
 0x1de   : > { %1277 = sbr.rel (%p3589_p1) target bundleno = 796 (0x31c), region = 180  ;;  %v1281_v2 = vld [vmem:[#allocation8] sm:$0xff] (!%p3589_p1)  ;;  %v1280_v3 = vadd.f32 (!%p3589_p1), %v1279_v1, %v1278_v0  ;;  %v3590_v15 = vld [vmem:[#allocation9] ss:$0 sm:$0xff] (!%p3589_p1)  ;;  %v3591_v17 = vld [vmem:[#allocation11] ss:$0 sm:$0xff] (!%p3589_p1) }
 0x1df   : > { %s3632_s10 = sshll.u32 %s5354_s6, 5  ;;  %s3635_s7 = sshll.u32 %s5354_s6, 6 }
 0x1e0   : > { %s5365_s25 = scalar_lea.vmem %s5929_s3, %s3632_s10  ;;  %s5370_s20 = scalar_lea.vmem %s5930_s27, %s3632_s10  ;;  %v1282_v4 = vadd.f32 (!%p3589_p1), %v1281_v2, %v1280_v3 }
 0x1e1   : > { %s5375_s18 = scalar_lea.vmem %s5931_s22, %s3632_s10  ;;  %s5380_s23 = scalar_lea.vmem %s5932_s15, %s3635_s7 }
 0x1e2   : > { %s1270_s3 = scalar_lea.vmem %s5933_s19, %s5354_s6  ;;  %s1273_s5 = scalar_lea.vmem %s5934_s28, %s5354_s6  ;;  %v1286_v5 = vsel (!%p3589_p1), %vm1285_vm0, %v1282_v4, 0.0 }
 0x1e3   : > { %s1111_s27 = scalar_lea.vmem [#allocation23], %s5323_s30  ;;  %1287 = vadd.xlane.f32.xlu0 (!%p3589_p1), %v1286_v5 }
 0x270   : > { %v1288_v6 = vpop.xlane.xlu0 %1287 }
 0x271   : > { %v1290_v7 = vmul.f32 0.03125, %v1288_v6 }
 0x273   : > { %v1291_v8 = vsub.f32 %v1282_v4, %v1290_v7 }
 0x275   : > { %v1292_v9 = vmul.f32 %v1291_v8, %v1291_v8 }
 0x277   : > { %v1293_v10 = vsel %vm1285_vm0, %v1292_v9, 0.0 }
 0x278   : > { %1294 = vadd.xlane.f32.xlu0 %v1293_v10 }
 0x305   : > { %v1295_v11 = vpop.xlane.xlu0 %1294 }
 0x306   : > { %v1296_v12 = vmul.f32 0.03125, %v1295_v11 }
 0x308   : > { %v1297_v13 = vadd.f32 1e-05, %v1296_v12 }
 0x30a   : > { %4037 = vrsqrt.f32 %v1297_v13 }
 0x314   : > { %v4038_v14 = vpop.eup %4037 }
 0x315   : > { %v1299_v16 = vmul.f32 %v4038_v14, %v1291_v8 }
 0x317   : > { %v1306_v18 = vmul.f32 %v3590_v15, %v1299_v16 }
 0x319   : > { %v1313_v19 = vadd.f32 %v3591_v17, %v1306_v18 }
 0x31b   : > { %1314 = vst.msk [vmem:[#allocation2] sm:$0xff] %vm1285_vm0, %v1313_v19 }
 0x31c PF: > { %v1316_v20 = vld [vmem:[%s5365_s25] sm:$0xff]  ;;  %v1317_v21 = vld [vmem:[%s5365_s25 + $0x8] sm:$0xff]  ;;  %v1318_v22 = vld [vmem:[%s5365_s25 + $0x10] sm:$0xff]  ;;  %v4616_v23 = vmov 0.0|0.0   ;;  %vm4617_vm1 = vmmov 0   ;;  %v4618_v26 = vmov 0.0   ;;  %v1416_v38 = vlaneseq }
 0x31d   : > { %3800 = vmatprep.subr.bf16.mxu1 %v4616_v23  ;;  %v3801_v24 = vpack.c.bf16 %v1317_v21, %v1316_v20  ;;  %v1319_v25 = vld [vmem:[%s5365_s25 + $0x18] sm:$0xff]  ;;  %3694 = vmatprep.mubr.msk.f32.mxu1 %vm4617_vm1, %v4618_v26  ;;  %vm1327_vm2 = vcmask 261120   ;;  %s5935_s11 = scalar_lea.vmem [#allocation12], %s5323_s30  ;;  %s4619_s12 = smov 104   ;;  %v4623_v36 = vmov 1983009808  }
 0x31e   : > { %3707 = vmatprep.subr.mxu0 %v4618_v26  ;;  %3709 = vmatprep.mubr.msk.f32.mxu0 %vm4617_vm1, %v4618_v26  ;;  %v3804_v27 = vpack.c.bf16 %v1319_v25, %v1318_v22  ;;  %v3592_v29 = vld [vmem:[%s5935_s11] ss:$0 sm:$0xff]  ;;  %s4620_s13 = smov 120   ;;  %s4621_s28 = smov 96   ;;  %v1414_v37 = vunpack.c.l.s4 %v4623_v36  ;;  %v5433_v40 = vshrl.u32 %v1416_v38, 7  ;;  %vm1843_vm3 = vcmask 64512  }
 0x31f   : > { %3802 = vmatpush3.bf16.msra.mxu1 %v3801_v24  ;;  %s4622_s8 = smov 112   ;;  %v4624_v41 = vmov 1934713408   ;;  %s5936_s0 = sld [smem:[#allocation55_spill]]  ;;  %vm2649_vm6 = vcmask 130048   ;;  %vm2651_vm7 = vcmask 195584  }
 0x320   : > { %3803 = vmatprep.subr.bf16.mxu1 %v4616_v23  ;;  %v1415_v39 = vunpack.c.0.s8 %v1414_v37  ;;  %v1446_v42 = vunpack.c.l.s4 %v4624_v41  ;;  %s4626_s21 = smov 64   ;;  %s4628_s25 = smov 8   ;;  %vm2906_vm8 = vcmask 523264  }
 0x321   : > { %s5938_s16 = scalar_lea.vmem [#allocation14], %s5323_s30  ;;  %s5939_s10 = scalar_lea.vmem [#allocation15], %s5323_s30 }
 0x322   : > { %v5409_v28 = vld [vmem:[#allocation2] sm:$0xff]  ;;  %v5440_v45 = vsub.s32 %v1415_v39, %v5433_v40  ;;  %v1447_v48 = vunpack.c.0.s8 %v1446_v42  ;;  %s5940_s7 = scalar_lea.vmem [#allocation17], %s5323_s30  ;;  %s5941_s22 = scalar_lea.vmem [#allocation18], %s5323_s30 }
 0x323   : > { %3805 = vmatpush3.bf16.msra.mxu1 %v3804_v27  ;;  %s5942_s15 = scalar_lea.vmem [#allocation20], %s5323_s30 }
 0x324   : > { %3697 = vmatprep.subr.mxu1 %v4618_v26  ;;  %v5451_v53 = vsub.s32 %v1447_v48, %v5433_v40 }
 0x325   : > { %s5937_s9 = scalar_lea.vmem %s5936_s0, %s5977_s29  ;;  %s4629_s29 = smov 24  }
 0x326   : > { %3695 = vmatmul.mubr.msk.f32.vlgmr.msra.gmra.mrb[0].mxu1 %vm1327_vm2, %v5409_v28 }
 0x327   : > { %3699 = vmatprep.mubr.msk.f32.mxu1 %vm4617_vm1, %v4618_v26 }
 0x3f9   : > { %v1397_v30 = vpop.f32.mrb[0].mxu1 }
 0x3fa   : > { %v5418_v31 = vadd.f32 %v3592_v29, %v1397_v30  ;;  %v3696_v32 = vpop.f32.mrb[1].mxu1 }
 0x3fc   : > { %1408 = vrot.lane.b32.xlu1 %v5418_v31, %s4619_s12  ;;  %1402 = vrot.lane.b32.xlu0 %v5418_v31, %s4620_s13  ;;  %s5946_s12 = sld [smem:[#allocation39_spill]] }
 0x400   : > { %1547 = vrot.lane.b32.xlu1 %v5418_v31, %s4621_s28  ;;  %1405 = vrot.lane.b32.xlu0 %v5418_v31, %s4622_s8 }
 0x402   : > { %p3626_p10 = scmp.ne.s32.totalorder %s5946_s12, 1 }
 0x403   : > { %s5947_s8 = sld [smem:[#allocation70_spill]] (!%p3626_p10)  ;;  %vm4631_vm9 = vmmov (!%p3626_p10), 0   ;;  %vm3096_vm10 = vcmask (!%p3626_p10), 253952   ;;  %s5952_s13 = sld [smem:[#allocation73_spill]] (!%p3626_p10)  ;;  %vm3190_vm11 = vcmask (!%p3626_p10), 8192  }
 0x404   : > { %s5953_s17 = sld [smem:[#allocation75_spill]] (!%p3626_p10) }
 0x409   : > { %s5948_s26 = smov (!%p3626_p10), %s5947_s8 }
 0x46e   : > { %v5424_v33 = vpop.permute.xlu0 %1402  ;;  %v5427_v34 = vpop.permute.xlu1 %1408 }
 0x46f   : > { %1549 = vrot.lane.b32.xlu0 %v5424_v33, %s4621_s28  ;;  %v1427_v46 = vcombine.low %v5424_v33, %v5427_v34  ;;  %v1428_v47 = vcombine.high %v5424_v33, %v5427_v34 }
 0x471   : > { %v1435_v51 = vrot.slane %v1427_v46, %v5440_v45  ;;  %v1442_v52 = vrot.slane %v1428_v47, %v5440_v45 }
 0x472   : > { %v5429_v35 = vpop.permute.xlu0 %1405  ;;  %v1548_v54 = vpop.permute.xlu1 %1547 }
 0x473   : > { %1553 = vrot.lane.b32.xlu0 %v5427_v34, %s4621_s28  ;;  %1551 = vrot.lane.b32.xlu1 %v5429_v35, %s4621_s28  ;;  %v1411_v43 = vcombine.low %v5418_v31, %v5429_v35  ;;  %v1412_v44 = vcombine.high %v5418_v31, %v5429_v35 }
 0x475   : > { %v1419_v49 = vrot.slane %v1411_v43, %v5440_v45  ;;  %v1426_v50 = vrot.slane %v1412_v44, %v5440_v45 }
 0x477   : > { %v1443_v55 = vcombine.low %v1419_v49, %v1435_v51  ;;  %v1444_v56 = vcombine.high %v1419_v49, %v1435_v51  ;;  %v1459_v57 = vcombine.low %v1426_v50, %v1442_v52  ;;  %v1460_v58 = vcombine.high %v1426_v50, %v1442_v52 }
 0x479   : > { %v1451_v60 = vrot.slane %v1443_v55, %v5451_v53  ;;  %v1458_v61 = vrot.slane %v1444_v56, %v5451_v53  ;;  %v1467_v62 = vrot.slane %v1459_v57, %v5451_v53  ;;  %v1474_v63 = vrot.slane %v1460_v58, %v5451_v53 }
 0x47b   : > { %v1479_v10 = vcombine.low %v1451_v60, %v1458_v61  ;;  %v3594_v11 = vcombine.high %v1451_v60, %v1458_v61  ;;  %v1495_v12 = vcombine.low %v1467_v62, %v1474_v63  ;;  %v3595_v13 = vcombine.high %v1467_v62, %v1474_v63 }
 0x47d   : > { %v1486_v22 = vrot.slane %v1479_v10, %v5440_v45  ;;  %v1494_v24 = vrot.slane %v3594_v11, %v5440_v45  ;;  %v1502_v25 = vrot.slane %v1495_v12, %v5440_v45  ;;  %v1510_v27 = vrot.slane %v3595_v13, %v5440_v45 }
 0x47f   : > { %v1511_v42 = vcombine.low %v1486_v22, %v1494_v24  ;;  %v1527_v43 = vcombine.low %v1502_v25, %v1510_v27  ;;  %v1512_v44 = vcombine.high %v1486_v22, %v1494_v24  ;;  %v1528_v46 = vcombine.high %v1502_v25, %v1510_v27 }
 0x481   : > { %v1519_v56 = vrot.slane %v1511_v42, %v5451_v53  ;;  %v1535_v57 = vrot.slane %v1527_v43, %v5451_v53  ;;  %v1526_v58 = vrot.slane %v1512_v44, %v5451_v53 }
 0x483   : > { %v1543_v62 = vcombine.low %v1519_v56, %v1535_v57 }
 0x4e1   : > { %v1550_v59 = vpop.permute.xlu0 %1549 }
 0x4e5   : > { %v1552_v0 = vpop.permute.xlu1 %1551  ;;  %v1554_v1 = vpop.permute.xlu0 %1553 }
 0x4e6   : > { %v1559_v2 = vcombine.low %v1548_v54, %v1552_v0  ;;  %v1560_v3 = vcombine.high %v1548_v54, %v1552_v0  ;;  %v1575_v4 = vcombine.low %v1550_v59, %v1554_v1  ;;  %v1576_v5 = vcombine.high %v1550_v59, %v1554_v1 }
 0x4e7   : > { %v1542_v59 = vrot.slane %v1528_v46, %v5451_v53  ;;  %v1544_v1 = vcombine.high %v1519_v56, %v1535_v57 }
 0x4e8   : > { %v1567_v6 = vrot.slane %v1559_v2, %v5440_v45  ;;  %v1574_v7 = vrot.slane %v1560_v3, %v5440_v45  ;;  %v1583_v8 = vrot.slane %v1575_v4, %v5440_v45  ;;  %v1590_v9 = vrot.slane %v1576_v5, %v5440_v45  ;;  %v2152_v4 = vld [vmem:[%s5937_s9] sm:$0x1] }
 0x4e9   : > { %v1545_v63 = vcombine.low %v1526_v58, %v1542_v59  ;;  %v1546_v3 = vcombine.high %v1526_v58, %v1542_v59  ;;  %vm2153_vm4 = vcmp.ne.s32.totalorder %v2152_v4, 0  ;;  %v2157_v5 = vsub.s32 0, %v5433_v40 }
 0x4ea   : > { %v1591_v14 = vcombine.low %v1567_v6, %v1583_v8  ;;  %v1592_v15 = vcombine.high %v1567_v6, %v1583_v8  ;;  %v1607_v16 = vcombine.low %v1574_v7, %v1590_v9  ;;  %v1608_v17 = vcombine.high %v1574_v7, %v1590_v9 }
 0x4eb   : > { %v4625_v6 = vmov 0  }
 0x4ec   : > { %v1599_v18 = vrot.slane %v1591_v14, %v5451_v53  ;;  %v1606_v19 = vrot.slane %v1592_v15, %v5451_v53  ;;  %v1615_v20 = vrot.slane %v1607_v16, %v5451_v53  ;;  %v1622_v21 = vrot.slane %v1608_v17, %v5451_v53 }
 0x4ed   : > { %v2154_v7 = vsel %vm2153_vm4, 1, %v4625_v6 }
 0x4ee   : > { %v1627_v29 = vcombine.low %v1599_v18, %v1606_v19  ;;  %v3596_v30 = vcombine.high %v1599_v18, %v1606_v19  ;;  %v1643_v32 = vcombine.low %v1615_v20, %v1622_v21  ;;  %v3597_v36 = vcombine.high %v1615_v20, %v1622_v21 }
 0x4ef   : > { %v2158_v8 = vrot.slane %v2154_v7, %v2157_v5 }
 0x4f0   : > { %v1634_v37 = vrot.slane %v1627_v29, %v5440_v45  ;;  %v1642_v38 = vrot.slane %v3596_v30, %v5440_v45  ;;  %v1650_v39 = vrot.slane %v1643_v32, %v5440_v45  ;;  %v1658_v41 = vrot.slane %v3597_v36, %v5440_v45 }
 0x4f1   : > { %vm2159_vm5 = vcmp.eq.s32.totalorder %v2158_v8, 1 }
 0x4f2   : > { %v1659_v47 = vcombine.low %v1634_v37, %v1642_v38  ;;  %v1675_v48 = vcombine.low %v1650_v39, %v1658_v41  ;;  %v1660_v49 = vcombine.high %v1634_v37, %v1642_v38  ;;  %v1676_v50 = vcombine.high %v1650_v39, %v1658_v41 }
 0x4f4   : > { %v1667_v51 = vrot.slane %v1659_v47, %v5451_v53  ;;  %v1683_v52 = vrot.slane %v1675_v48, %v5451_v53  ;;  %v1674_v54 = vrot.slane %v1660_v49, %v5451_v53  ;;  %v1690_v55 = vrot.slane %v1676_v50, %v5451_v53 }
 0x4f6   : > { %v1691_v60 = vcombine.low %v1667_v51, %v1683_v52  ;;  %v1693_v61 = vcombine.low %v1674_v54, %v1690_v55  ;;  %v1692_v0 = vcombine.high %v1667_v51, %v1683_v52  ;;  %v1694_v2 = vcombine.high %v1674_v54, %v1690_v55 }
 0x4f8   : > { %3698 = vmatpush3.xpose.msk.msra.mxu1 %vm1843_vm3, %v1691_v60  ;;  %3708 = vmatpush3.xpose.msk.msra.mxu0 %vm1843_vm3, %v1693_v61 }
 0x4f9   : > { %3702 = vmatprep.subr.mxu1 %v4618_v26  ;;  %3717 = vmatprep.subr.mxu0 %v4618_v26 }
 0x4fb   : > { %3700 = vmatmul.mubr.msk.f32.vlgmr.msra.gmra.mrb[2].mxu1 %vm1843_vm3, %v1543_v62  ;;  %3710 = vmatmul.mubr.msk.f32.vlgmr.msra.gmra.mrb[0].mxu0 %vm1843_vm3, %v1545_v63 }
 0x4fc   : > { %3703 = vmatpush3.xpose.msk.msra.mxu1 %vm1843_vm3, %v1692_v0  ;;  %3704 = vmatprep.mubr.msk.f32.mxu1 %vm4617_vm1, %v4618_v26 }
 0x4fd   : > { %3712 = vmatprep.subr.mxu1 %v4618_v26  ;;  %3719 = vmatprep.mubr.msk.f32.mxu0 %vm4617_vm1, %v4618_v26 }
 0x4ff   : > { %3705 = vmatmul.mubr.msk.f32.vlgmr.msra.gmra.mrb[4].mxu1 %vm1843_vm3, %v1544_v1 }
 0x500   : > { %3713 = vmatpush3.xpose.msk.msra.mxu1 %vm1843_vm3, %v1694_v2  ;;  %3714 = vmatprep.mubr.msk.f32.mxu1 %vm4617_vm1, %v4618_v26 }
 0x501   : > { %3722 = vmatprep.subr.mxu1 %v4618_v26 }
 0x503   : > { %3715 = vmatmul.mubr.msk.f32.vlgmr.msra.gmra.mrb[6].mxu1 %vm1843_vm3, %v1546_v3 }
 0x504   : > { %3724 = vmatprep.mubr.msk.f32.mxu1 %vm4617_vm1, %v4618_v26 }
 0x5ce   : > { %v1916_v9 = vpop.f32.mrb[2].mxu1  ;;  %v2068_v10 = vpop.f32.mrb[0].mxu0 }
 0x5cf   : > { %v2148_v11 = vmul.f32 0.35355338, %v1916_v9  ;;  %v3701_v12 = vpop.f32.mrb[3].mxu1  ;;  %v3711_v13 = vpop.f32.mrb[1].mxu0  ;;  %v2150_v17 = vmul.f32 0.35355338, %v2068_v10 }
 0x5d1   : > { %v2160_v14 = vsel %vm2159_vm5, -1e+09, %v2148_v11  ;;  %v2162_v25 = vsel %vm2159_vm5, -1e+09, %v2150_v17 }
 0x5d2   : > { %v1992_v15 = vpop.f32.mrb[4].mxu1  ;;  %v2164_v16 = vsel %vm1843_vm3, %v2160_v14, -inf  ;;  %v2170_v29 = vsel %vm1843_vm3, %v2162_v25, -inf }
 0x5d3   : > { %v2149_v18 = vmul.f32 0.35355338, %v1992_v15  ;;  %2165 = vmax.xlane.f32.xlu1 %v2164_v16  ;;  %v3706_v19 = vpop.f32.mrb[5].mxu1 }
 0x5d5   : > { %v2161_v40 = vsel %vm2159_vm5, -1e+09, %v2149_v18 }
 0x5d6   : > { %v2144_v20 = vpop.f32.mrb[6].mxu1  ;;  %v2167_v21 = vsel %vm1843_vm3, %v2161_v40, -inf }
 0x5d7   : > { %v2151_v22 = vmul.f32 0.35355338, %v2144_v20  ;;  %2168 = vmax.xlane.f32.xlu0 %v2167_v21  ;;  %v3716_v24 = vpop.f32.mrb[7].mxu1 }
 0x5d9   : > { %v2163_v27 = vsel %vm2159_vm5, -1e+09, %v2151_v22 }
 0x5da   : > { %v2173_v30 = vsel %vm1843_vm3, %v2163_v27, -inf }
 0x5db   : > { %2171 = vmax.xlane.f32.xlu0 %v2170_v29  ;;  %2174 = vmax.xlane.f32.xlu1 %v2173_v30 }
 0x5ec   : > { %1697 = vrot.lane.b32.xlu1 %v5424_v33, %s4626_s21 }
 0x5f1   : > { %1695 = vrot.lane.b32.xlu0 %v5418_v31, %s4626_s21 }
 0x660   : > { %v2166_v32 = vpop.xlane.xlu1 %2165 }
 0x661   : > { %v2176_v36 = vsub.f32 %v2160_v14, %v2166_v32 }
 0x663   : > { %v2180_v37 = vmul.f32 1.442695, %v2176_v36 }
 0x664   : > { %v2169_v38 = vpop.xlane.xlu0 %2168 }
 0x665   : > { %4039 = vpow2.f32 %v2180_v37  ;;  %v2177_v39 = vsub.f32 %v2161_v40, %v2169_v38 }
 0x667   : > { %v2182_v41 = vmul.f32 1.442695, %v2177_v39 }
 0x668   : > { %v2172_v42 = vpop.xlane.xlu0 %2171  ;;  %v2175_v43 = vpop.xlane.xlu1 %2174 }
 0x669   : > { %4041 = vpow2.f32 %v2182_v41  ;;  %v2178_v44 = vsub.f32 %v2162_v25, %v2172_v42  ;;  %v2179_v46 = vsub.f32 %v2163_v27, %v2175_v43 }
 0x66b   : > { %v2184_v47 = vmul.f32 1.442695, %v2178_v44  ;;  %v2186_v48 = vmul.f32 1.442695, %v2179_v46 }
 0x66c   : > { %v1696_v56 = vpop.permute.xlu0 %1695  ;;  %v1698_v57 = vpop.permute.xlu1 %1697 }
 0x66d   : > { %4043 = vpow2.f32 %v2184_v47 }
 0x66e   : > { %4045 = vpow2.f32 %v2186_v48 }
 0x66f   : > { %v5519_v33 = vpop.eup %4039 }
 0x670   : > { %v2188_v31 = vsel %vm1843_vm3, %v5519_v33, 0.0 }
 0x671   : > { %2189 = vadd.xlane.f32.xlu0 %v2188_v31  ;;  %v2653_v31 = vld [vmem:[%s5370_s20] sm:$0xff] }
 0x673   : > { %v4042_v49 = vpop.eup %4041 }
 0x674   : > { %v2191_v50 = vsel %vm1843_vm3, %v4042_v49, 0.0 }
 0x675   : > { %2192 = vadd.xlane.f32.xlu1 %v2191_v50 }
 0x677   : > { %v5524_v51 = vpop.eup %4043 }
 0x678   : > { %v5526_v52 = vpop.eup %4045  ;;  %v2194_v54 = vsel %vm1843_vm3, %v5524_v51, 0.0 }
 0x679   : > { %2195 = vadd.xlane.f32.xlu0 %v2194_v54  ;;  %v2197_v55 = vsel %vm1843_vm3, %v5526_v52, 0.0 }
 0x67a   : > { %2198 = vadd.xlane.f32.xlu1 %v2197_v55 }
 0x68b   : > { %1699 = vrot.lane.b32.xlu1 %v5429_v35, %s4626_s21 }
 0x68f   : > { %1701 = vrot.lane.b32.xlu0 %v5427_v34, %s4626_s21 }
 0x6fe   : > { %v2190_v58 = vpop.xlane.xlu0 %2189 }
 0x6ff   : > { %4047 = vrcp.f32 %v2190_v58 }
 0x702   : > { %v2193_v59 = vpop.xlane.xlu1 %2192 }
 0x703   : > { %4049 = vrcp.f32 %v2193_v59 }
 0x706   : > { %v2196_v60 = vpop.xlane.xlu0 %2195 }
 0x707   : > { %v2199_v61 = vpop.xlane.xlu1 %2198  ;;  %4051 = vrcp.f32 %v2196_v60 }
 0x708   : > { %4053 = vrcp.f32 %v2199_v61 }
 0x709   : > { %v4048_v24 = vpop.eup %4047 }
 0x70a   : > { %v1702_v62 = vpop.permute.xlu0 %1701  ;;  %v2204_v42 = vmul.f32 %v4048_v24, %v5519_v33 }
 0x70b   : > { %v1723_v63 = vcombine.low %v1698_v57, %v1702_v62  ;;  %v1724_v0 = vcombine.high %v1698_v57, %v1702_v62  ;;  %v1700_v1 = vpop.permute.xlu1 %1699 }
 0x70c   : > { %v1707_v2 = vcombine.low %v1696_v56, %v1700_v1  ;;  %v1708_v3 = vcombine.high %v1696_v56, %v1700_v1 }
 0x70d   : > { %v1731_v4 = vrot.slane %v1723_v63, %v5440_v45  ;;  %v1738_v5 = vrot.slane %v1724_v0, %v5440_v45  ;;  %v4050_v30 = vpop.eup %4049 }
 0x70e   : > { %v1715_v35 = vrot.slane %v1707_v2, %v5440_v45  ;;  %v1722_v34 = vrot.slane %v1708_v3, %v5440_v45  ;;  %v2205_v43 = vmul.f32 %v4050_v30, %v4042_v49  ;;  %v2654_v49 = vld [vmem:[%s5370_s20 + $0x8] sm:$0xff] }
 0x70f   : > { %v3807_v50 = vpack.c.bf16 %v2654_v49, %v2653_v31 }
 0x710   : > { %v1739_v6 = vcombine.low %v1715_v35, %v1731_v4  ;;  %v1740_v7 = vcombine.high %v1715_v35, %v1731_v4  ;;  %v1755_v8 = vcombine.low %v1722_v34, %v1738_v5  ;;  %v1756_v9 = vcombine.high %v1722_v34, %v1738_v5 }
 0x711   : > { %v4052_v41 = vpop.eup %4051 }
 0x712   : > { %v1747_v10 = vrot.slane %v1739_v6, %v5451_v53  ;;  %v1754_v11 = vrot.slane %v1740_v7, %v5451_v53  ;;  %v1763_v12 = vrot.slane %v1755_v8, %v5451_v53  ;;  %v1770_v13 = vrot.slane %v1756_v9, %v5451_v53  ;;  %v4054_v44 = vpop.eup %4053  ;;  %v2655_v6 = vld [vmem:[%s5370_s20 + $0x10] sm:$0xff]  ;;  %v2656_v7 = vld [vmem:[%s5370_s20 + $0x18] sm:$0xff]  ;;  %s4627_s20 = smov 16  }
 0x713   : > { %v2206_v48 = vmul.f32 %v4052_v41, %v5524_v51  ;;  %v2207_v33 = vmul.f32 %v4054_v44, %v5526_v52  ;;  %v3614_v44 = vld [vmem:[%s5938_s16] ss:$0 sm:$0xff] }
 0x714   : > { %v1775_v14 = vcombine.low %v1747_v10, %v1754_v11  ;;  %v3598_v15 = vcombine.high %v1747_v10, %v1754_v11  ;;  %v1791_v16 = vcombine.low %v1763_v12, %v1770_v13  ;;  %v3599_v17 = vcombine.high %v1763_v12, %v1770_v13 }
 0x715   : > { %v3810_v12 = vpack.c.bf16 %v2656_v7, %v2655_v6  ;;  %v2800_v7 = vld [vmem:[%s5375_s18 + $0x10] sm:$0xff] }
 0x716   : > { %v1782_v18 = vrot.slane %v1775_v14, %v5440_v45  ;;  %v1790_v19 = vrot.slane %v3598_v15, %v5440_v45  ;;  %v1798_v40 = vrot.slane %v1791_v16, %v5440_v45  ;;  %v1806_v20 = vrot.slane %v3599_v17, %v5440_v45 }
 0x718   : > { %v1807_v21 = vcombine.low %v1782_v18, %v1790_v19  ;;  %v1808_v22 = vcombine.high %v1782_v18, %v1790_v19  ;;  %v1823_v25 = vcombine.low %v1798_v40, %v1806_v20  ;;  %v1824_v27 = vcombine.high %v1798_v40, %v1806_v20 }
 0x71a   : > { %v1815_v29 = vrot.slane %v1807_v21, %v5451_v53  ;;  %v1831_v32 = vrot.slane %v1823_v25, %v5451_v53  ;;  %v1822_v36 = vrot.slane %v1808_v22, %v5451_v53  ;;  %v1838_v37 = vrot.slane %v1824_v27, %v5451_v53 }
 0x71c   : > { %v1839_v38 = vcombine.low %v1815_v29, %v1831_v32  ;;  %v1840_v39 = vcombine.high %v1815_v29, %v1831_v32  ;;  %v1841_v46 = vcombine.low %v1822_v36, %v1838_v37  ;;  %v1842_v47 = vcombine.high %v1822_v36, %v1838_v37 }
 0x71e   : > { %3718 = vmatpush3.msra.mxu0 %v1839_v38  ;;  %3723 = vmatpush3.msra.mxu1 %v1840_v39 }
 0x71f   : > { %3720 = vmatmul.mubr.msk.f32.vlgmr.msra.gmra.mrb[2].mxu0 %vm1843_vm3, %v2204_v42  ;;  %3725 = vmatmul.mubr.msk.f32.vlgmr.msra.gmra.mrb[8].mxu1 %vm1843_vm3, %v2205_v43 }
 0x720   : > { %3727 = vmatprep.subr.mxu0 %v4618_v26  ;;  %3732 = vmatprep.subr.mxu1 %v4618_v26 }
 0x721   : > { %3728 = vmatpush3.msra.mxu0 %v1841_v46  ;;  %3733 = vmatpush3.msra.mxu1 %v1842_v47 }
 0x722   : > { %3729 = vmatprep.mubr.msk.f32.mxu0 %vm4617_vm1, %v4618_v26  ;;  %3734 = vmatprep.mubr.msk.f32.mxu1 %vm4617_vm1, %v4618_v26 }
 0x723   : > { %3730 = vmatmul.mubr.msk.f32.vlgmr.msra.gmra.mrb[4].mxu0 %vm1843_vm3, %v2206_v48  ;;  %3735 = vmatmul.mubr.msk.f32.vlgmr.msra.gmra.mrb[10].mxu1 %vm1843_vm3, %v2207_v33 }
 0x724   : > { %3806 = vmatprep.subr.bf16.mxu0 %v4616_v23  ;;  %3745 = vmatprep.mubr.msk.f32.mxu0 %vm4617_vm1, %v4618_v26 }
 0x725   : > { %3812 = vmatprep.subr.bf16.mxu1 %v4616_v23  ;;  %3756 = vmatprep.mubr.msk.f32.mxu1 %vm4617_vm1, %v4618_v26 }
 0x726   : > { %3808 = vmatpush3.bf16.msra.mxu0 %v3807_v50 }
 0x727   : > { %3809 = vmatprep.subr.bf16.mxu0 %v4616_v23 }
 0x72a   : > { %3811 = vmatpush3.bf16.msra.mxu0 %v3810_v12 }
 0x72b   : > { %3818 = vmatprep.subr.bf16.mxu0 %v4616_v23 }
 0x7f2   : > { %v2277_v51 = vpop.f32.mrb[2].mxu0  ;;  %v2350_v52 = vpop.f32.mrb[8].mxu1 }
 0x7f3   : > { %v3721_v54 = vpop.f32.mrb[3].mxu0  ;;  %v3726_v55 = vpop.f32.mrb[9].mxu1 }
 0x7f6   : > { %v2423_v56 = vpop.f32.mrb[4].mxu0  ;;  %v2496_v57 = vpop.f32.mrb[10].mxu1 }
 0x7f7   : > { %v2500_v58 = vcombine.low %v2277_v51, %v2423_v56  ;;  %v2501_v59 = vcombine.high %v2277_v51, %v2423_v56  ;;  %v2516_v60 = vcombine.low %v2350_v52, %v2496_v57  ;;  %v2517_v61 = vcombine.high %v2350_v52, %v2496_v57  ;;  %v3731_v62 = vpop.f32.mrb[5].mxu0  ;;  %v3736_v63 = vpop.f32.mrb[11].mxu1 }
 0x7f9   : > { %v2508_v0 = vrot.slane %v2500_v58, %v5440_v45  ;;  %v2515_v1 = vrot.slane %v2501_v59, %v5440_v45  ;;  %v2524_v2 = vrot.slane %v2516_v60, %v5440_v45  ;;  %v2531_v3 = vrot.slane %v2517_v61, %v5440_v45  ;;  %v3616_v58 = vld [vmem:[%s5939_s10] ss:$0 sm:$0xff]  ;;  %s5950_s10 = sld [smem:[#allocation74_spill]] (!%p3626_p10) }
 0x7fa   : > { %v3617_v60 = vld [vmem:[%s5940_s7] ss:$0 sm:$0xff] }
 0x7fb   : > { %v2532_v4 = vcombine.low %v2508_v0, %v2524_v2  ;;  %v2533_v5 = vcombine.high %v2508_v0, %v2524_v2  ;;  %v2548_v35 = vcombine.low %v2515_v1, %v2531_v3  ;;  %v2549_v34 = vcombine.high %v2515_v1, %v2531_v3 }
 0x7fd   : > { %v2540_v8 = vrot.slane %v2532_v4, %v5451_v53  ;;  %v2547_v9 = vrot.slane %v2533_v5, %v5451_v53  ;;  %v2556_v10 = vrot.slane %v2548_v35, %v5451_v53  ;;  %v2563_v11 = vrot.slane %v2549_v34, %v5451_v53  ;;  %v2798_v35 = vld [vmem:[%s5375_s18] sm:$0xff]  ;;  %v2799_v34 = vld [vmem:[%s5375_s18 + $0x8] sm:$0xff] }
 0x7fe   : > { %v3813_v6 = vpack.c.bf16 %v2799_v34, %v2798_v35  ;;  %v3018_v34 = vld [vmem:[%s5948_s26 + $0x18] sm:$0xff] (!%p3626_p10) }
 0x7ff   : > { %v2568_v13 = vcombine.low %v2540_v8, %v2547_v9  ;;  %v3612_v14 = vcombine.high %v2540_v8, %v2547_v9  ;;  %v2584_v15 = vcombine.low %v2556_v10, %v2563_v11  ;;  %v3613_v16 = vcombine.high %v2556_v10, %v2563_v11  ;;  %v2801_v8 = vld [vmem:[%s5375_s18 + $0x18] sm:$0xff]  ;;  %s5943_s18 = scalar_lea.vmem [#allocation21], %s5323_s30 }
 0x800   : > { %3814 = vmatpush3.bf16.msra.mxu1 %v3813_v6  ;;  %v4632_v6 = vmov (!%p3626_p10), 0.0  }
 0x801   : > { %v2575_v17 = vrot.slane %v2568_v13, %v5440_v45  ;;  %v2583_v18 = vrot.slane %v3612_v14, %v5440_v45  ;;  %v2591_v19 = vrot.slane %v2584_v15, %v5440_v45  ;;  %v2599_v40 = vrot.slane %v3613_v16, %v5440_v45  ;;  %3815 = vmatprep.subr.bf16.mxu1 %v4616_v23  ;;  %v3618_v13 = vld [vmem:[%s5941_s22] ss:$0 sm:$0xff] }
 0x802   : > { %v3619_v15 = vld [vmem:[%s5942_s15] ss:$0 sm:$0xff] }
 0x803   : > { %v2601_v20 = vcombine.high %v2575_v17, %v2583_v18  ;;  %v2617_v21 = vcombine.high %v2591_v19, %v2599_v40  ;;  %v2600_v22 = vcombine.low %v2575_v17, %v2583_v18  ;;  %v2616_v24 = vcombine.low %v2591_v19, %v2599_v40  ;;  %v2891_v18 = vld [vmem:[%s5380_s23] sm:$0xff]  ;;  %v2892_v19 = vld [vmem:[%s5380_s23 + $0x8] sm:$0xff] }
 0x804   : > { %v3819_v40 = vpack.c.bf16 %v2892_v19, %v2891_v18  ;;  %v3112_v18 = vld [vmem:[%s5950_s10] sm:$0xff] (!%p3626_p10)  ;;  %v3113_v19 = vld [vmem:[%s5950_s10 + $0x8] sm:$0xff] (!%p3626_p10) }
 0x805   : > { %v2615_v25 = vrot.slane %v2601_v20, %v5451_v53  ;;  %v2631_v27 = vrot.slane %v2617_v21, %v5451_v53  ;;  %v2608_v29 = vrot.slane %v2600_v22, %v5451_v53  ;;  %v2624_v30 = vrot.slane %v2616_v24, %v5451_v53  ;;  %v2893_v20 = vld [vmem:[%s5380_s23 + $0x10] sm:$0xff]  ;;  %v2894_v21 = vld [vmem:[%s5380_s23 + $0x18] sm:$0xff]  ;;  %v2895_v24 = vld [vmem:[%s5380_s23 + $0x20] sm:$0xff] }
 0x806   : > { %v3822_v22 = vpack.c.bf16 %v2894_v21, %v2893_v20  ;;  %v3837_v20 = vpack.c.bf16 (!%p3626_p10), %v3113_v19, %v3112_v18  ;;  %v3115_v21 = vld [vmem:[%s5950_s10 + $0x18] sm:$0xff] (!%p3626_p10) }
 0x807   : > { %v2634_v32 = vcombine.low %v2615_v25, %v2631_v27  ;;  %v2633_v36 = vcombine.high %v2608_v29, %v2624_v30  ;;  %v2635_v37 = vcombine.high %v2615_v25, %v2631_v27  ;;  %v2632_v38 = vcombine.low %v2608_v29, %v2624_v30  ;;  %v2896_v25 = vld [vmem:[%s5380_s23 + $0x28] sm:$0xff]  ;;  %v2897_v29 = vld [vmem:[%s5380_s23 + $0x30] sm:$0xff]  ;;  %v2898_v30 = vld [vmem:[%s5380_s23 + $0x38] sm:$0xff] }
 0x808   : > { %v3825_v27 = vpack.c.bf16 %v2896_v25, %v2895_v24 }
 0x809   : > { %2641 = vrot.lane.b32.xlu0 %v2634_v32, %s4627_s20  ;;  %2637 = vrot.lane.b32.xlu1 %v2633_v36, %s4628_s25  ;;  %v3828_v32 = vpack.c.bf16 %v2898_v30, %v2897_v29  ;;  %v3620_v36 = vld [vmem:[%s5943_s18] ss:$0 sm:$0xff]  ;;  %s5949_s25 = sld [smem:[#allocation71_spill]] (!%p3626_p10) }
 0x80d   : > { %2645 = vrot.lane.b32.xlu1 %v2635_v37, %s4629_s29 }
 0x87b   : > { %v2638_v45 = vpop.permute.xlu1 %2637  ;;  %v2642_v39 = vpop.permute.xlu0 %2641 }
 0x87c   : > { %v2648_v41 = vsel %vm1843_vm3, %v2632_v38, %v2638_v45 }
 0x87d   : > { %v2650_v43 = vsel %vm2649_vm6, %v2648_v41, %v2642_v39 }
 0x87f   : > { %v2646_v42 = vpop.permute.xlu1 %2645 }
 0x880   : > { %v2652_v53 = vsel %vm2651_vm7, %v2650_v43, %v2646_v42 }
 0x881   : > { %3746 = vmatmul.mubr.msk.f32.vlgmr.msra.gmra.mrb[6].mxu0 %vm1327_vm2, %v2652_v53 }
 0x882   : > { %3775 = vmatprep.mubr.msk.f32.mxu0 %vm4617_vm1, %v4618_v26  ;;  %3820 = vmatpush3.bf16.msra.mxu0 %v3819_v40  ;;  %v3114_v40 = vld [vmem:[%s5950_s10 + $0x10] sm:$0xff] (!%p3626_p10) }
 0x883   : > { %3821 = vmatprep.subr.bf16.mxu0 %v4616_v23 }
 0x886   : > { %3823 = vmatpush3.bf16.msra.mxu0 %v3822_v22  ;;  %v3840_v22 = vpack.c.bf16 (!%p3626_p10), %v3115_v21, %v3114_v40 }
 0x887   : > { %3824 = vmatprep.subr.bf16.mxu0 %v4616_v23 }
 0x88a   : > { %3826 = vmatpush3.bf16.msra.mxu0 %v3825_v27 }
 0x88b   : > { %3827 = vmatprep.subr.bf16.mxu0 %v4616_v23  ;;  %v3622_v23 = vld [vmem:[%s1111_s27] ss:$0 sm:$0xff]  ;;  %s5951_s27 = sld [smem:[#allocation72_spill]] (!%p3626_p10) }
 0x88e   : > { %3829 = vmatpush3.bf16.msra.mxu0 %v3828_v32 }
 0x891   : > { %v3094_v30 = vld [vmem:[%s5951_s27] sm:$0x1] (!%p3626_p10) }
 0x954   : > { %v2733_v46 = vpop.f32.mrb[6].mxu0 }
 0x955   : > { %v2734_v47 = vadd.f32 %v3614_v44, %v2733_v46  ;;  %v3747_v48 = vpop.f32.mrb[7].mxu0 }
 0x957   : > { %v2737_v33 = vadd.f32 %v2734_v47, %v5409_v28 }
 0x959   : > { %v2740_v31 = vsel %vm1327_vm2, %v2737_v33, 0.0 }
 0x95a   : > { %2741 = vadd.xlane.f32.xlu0 %v2740_v31 }
 0x9e7   : > { %v2742_v49 = vpop.xlane.xlu0 %2741 }
 0x9e8   : > { %v2744_v50 = vmul.f32 0.03125, %v2742_v49 }
 0x9ea   : > { %v2745_v51 = vsub.f32 %v2737_v33, %v2744_v50 }
 0x9ec   : > { %v2746_v52 = vmul.f32 %v2745_v51, %v2745_v51 }
 0x9ee   : > { %v2747_v54 = vsel %vm1327_vm2, %v2746_v52, 0.0 }
 0x9ef   : > { %2748 = vadd.xlane.f32.xlu1 %v2747_v54 }
 0xa7c   : > { %v2749_v26 = vpop.xlane.xlu1 %2748 }
 0xa7d   : > { %v2750_v55 = vmul.f32 0.03125, %v2749_v26 }
 0xa7f   : > { %v2751_v56 = vadd.f32 1e-05, %v2750_v55 }
 0xa81   : > { %4055 = vrsqrt.f32 %v2751_v56 }
 0xa8b   : > { %v4056_v57 = vpop.eup %4055 }
 0xa8c   : > { %v2753_v59 = vmul.f32 %v4056_v57, %v2745_v51 }
 0xa8e   : > { %v2760_v61 = vmul.f32 %v3616_v58, %v2753_v59 }
 0xa90   : > { %v2767_v62 = vadd.f32 %v3617_v60, %v2760_v61  ;;  %v3624_v61 = vld [vmem:[%s1270_s3] ss:$0 sm:$0xff] }
 0xa92   : > { %v2768_v63 = vadd.f32 %v2767_v62, %v5409_v28  ;;  %v3816_v28 = vpack.c.bf16 %v2801_v8, %v2800_v7  ;;  %v3019_v8 = vld [vmem:[%s5949_s25] sm:$0x1] (!%p3626_p10) }
 0xa94   : > { %v2771_v0 = vsel %vm1327_vm2, %v2768_v63, 0.0  ;;  %3817 = vmatpush3.bf16.msra.mxu1 %v3816_v28 }
 0xa95   : > { %2772 = vadd.xlane.f32.xlu0 %v2771_v0 }
 0xb22   : > { %v2773_v1 = vpop.xlane.xlu0 %2772 }
 0xb23   : > { %v2774_v2 = vmul.f32 0.03125, %v2773_v1 }
 0xb25   : > { %v2775_v3 = vsub.f32 %v2768_v63, %v2774_v2  ;;  %v3625_v63 = vld [vmem:[%s1273_s5] ss:$0 sm:$0xff] }
 0xb26   : > { %v3015_v2 = vld [vmem:[%s5947_s8] sm:$0xff] (!%p3626_p10) }
 0xb27   : > { %v2776_v4 = vmul.f32 %v2775_v3, %v2775_v3 }
 0xb29   : > { %v2777_v5 = vsel %vm1327_vm2, %v2776_v4, 0.0  ;;  %v3017_v4 = vld [vmem:[%s5948_s26 + $0x10] sm:$0xff] (!%p3626_p10) }
 0xb2a   : > { %2778 = vadd.xlane.f32.xlu0 %v2777_v5  ;;  %v4630_v5 = vmov (!%p3626_p10), 0.0|0.0   ;;  %v3834_v7 = vpack.c.bf16 (!%p3626_p10), %v3018_v34, %v3017_v4 }
 0xb2b   : > { %3830 = vmatprep.subr.bf16.mxu0 (!%p3626_p10), %v4630_v5  ;;  %3836 = vmatprep.subr.bf16.mxu1 (!%p3626_p10), %v4630_v5 }
 0xbb7   : > { %v2779_v9 = vpop.xlane.xlu0 %2778 }
 0xbb8   : > { %v2780_v10 = vmul.f32 0.03125, %v2779_v9 }
 0xbba   : > { %v2781_v11 = vadd.f32 1e-05, %v2780_v10 }
 0xbbc   : > { %4057 = vrsqrt.f32 %v2781_v11 }
 0xbc6   : > { %v4058_v12 = vpop.eup %4057 }
 0xbc7   : > { %v2783_v14 = vmul.f32 %v4058_v12, %v2775_v3  ;;  %v3016_v3 = vld [vmem:[%s5948_s26 + $0x8] sm:$0xff] (!%p3626_p10) }
 0xbc8   : > { %v3831_v35 = vpack.c.bf16 (!%p3626_p10), %v3016_v3, %v3015_v2 }
 0xbc9   : > { %v2790_v16 = vmul.f32 %v3618_v13, %v2783_v14 }
 0xbcb   : > { %v2797_v17 = vadd.f32 %v3619_v15, %v2790_v16 }
 0xbcd   : > { %3757 = vmatmul.mubr.msk.f32.vlgmr.msra.gmra.mrb[12].mxu1 %vm1327_vm2, %v2797_v17 }
 0xbce   : > { %3797 = vmatprep.mubr.msk.f32.mxu1 (!%p3626_p10), %vm4631_vm9, %v4632_v6  ;;  %3838 = vmatpush3.bf16.msra.mxu1 (!%p3626_p10), %v3837_v20 }
 0xbcf   : > { %3839 = vmatprep.subr.bf16.mxu1 (!%p3626_p10), %v4630_v5 }
 0xbd2   : > { %3841 = vmatpush3.bf16.msra.mxu1 (!%p3626_p10), %v3840_v22 }
 0xca0   : > { %v2878_v37 = vpop.f32.mrb[12].mxu1 }
 0xca1   : > { %v2879_v38 = vadd.f32 %v3620_v36, %v2878_v37  ;;  %v3758_v45 = vpop.f32.mrb[13].mxu1  ;;  %v3095_v36 = vld [vmem:[%s5952_s13] sm:$0x1] (!%p3626_p10) }
 0xca2   : > { %v3116_v45 = vld [vmem:[%s5953_s17] sm:$0x1] (!%p3626_p10) }
 0xca3   : > { %v2883_v39 = vmul.f32 0.044715, %v2879_v38  ;;  %v2882_v46 = vmul.f32 0.5, %v2879_v38 }
 0xca5   : > { %v2884_v41 = vmul.f32 %v2883_v39, %v2879_v38 }
 0xca7   : > { %v2885_v42 = vmul.f32 %v2884_v41, %v2879_v38 }
 0xca9   : > { %v2886_v43 = vadd.f32 %v2885_v42, %v2879_v38 }
 0xcab   : > { %v2887_v53 = vmul.f32 0.7978846, %v2886_v43 }
 0xcad   : > { %4059 = vtanh.f32 %v2887_v53 }
 0xcb7   : > { %v4060_v44 = vpop.eup %4059 }
 0xcb8   : > { %v2889_v47 = vadd.f32 1.0, %v4060_v44 }
 0xcba   : > { %v2890_v48 = vmul.f32 %v2889_v47, %v2882_v46 }
 0xcbc   : > { %3776 = vmatmul.mubr.msk.f32.vlgmr.msra.gmra.mrb[8].mxu0 %vm2906_vm8, %v2890_v48 }
 0xcbd   : > { %3786 = vmatprep.mubr.msk.f32.mxu0 (!%p3626_p10), %vm4631_vm9, %v4632_v6  ;;  %3832 = vmatpush3.bf16.msra.mxu0 (!%p3626_p10), %v3831_v35 }
 0xcbe   : > { %3833 = vmatprep.subr.bf16.mxu0 (!%p3626_p10), %v4630_v5 }
 0xcc1   : > { %3835 = vmatpush3.bf16.msra.mxu0 (!%p3626_p10), %v3834_v7 }
 0xd8f   : > { %v2976_v33 = vpop.f32.mrb[8].mxu0 }
 0xd90   : > { %v2977_v31 = vadd.f32 %v3622_v23, %v2976_v33  ;;  %v3777_v49 = vpop.f32.mrb[9].mxu0 }
 0xd92   : > { %v2980_v50 = vadd.f32 %v2977_v31, %v2797_v17 }
 0xd94   : > { %v2983_v51 = vsel %vm1327_vm2, %v2980_v50, 0.0 }
 0xd95   : > { %2984 = vadd.xlane.f32.xlu1 %v2983_v51 }
 0xe22   : > { %v2985_v52 = vpop.xlane.xlu1 %2984 }
 0xe23   : > { %v2986_v54 = vmul.f32 0.03125, %v2985_v52 }
 0xe25   : > { %v2987_v26 = vsub.f32 %v2980_v50, %v2986_v54 }
 0xe27   : > { %v2988_v55 = vmul.f32 %v2987_v26, %v2987_v26 }
 0xe29   : > { %v2989_v56 = vsel %vm1327_vm2, %v2988_v55, 0.0 }
 0xe2a   : > { %2990 = vadd.xlane.f32.xlu0 %v2989_v56 }
 0xeb7   : > { %v2991_v57 = vpop.xlane.xlu0 %2990 }
 0xeb8   : > { %v2992_v58 = vmul.f32 0.03125, %v2991_v57 }
 0xeba   : > { %v2993_v59 = vadd.f32 1e-05, %v2992_v58 }
 0xebc   : > { %4061 = vrsqrt.f32 %v2993_v59 }
 0xec6   : > { %v4062_v60 = vpop.eup %4061 }
 0xec7   : > { %v2995_v62 = vmul.f32 %v4062_v60, %v2987_v26  ;;  %3014 = sbr.rel (%p3626_p10) target bundleno = 4542 (0x11be), region = 184 }
 0xec9   : > { %v3002_v0 = vmul.f32 %v3624_v61, %v2995_v62 }
 0xecb   : > { %v3009_v1 = vadd.f32 %v3625_v63, %v3002_v0 }
 0xecd   : > { %3010 = vst.msk [vmem:[#allocation2] sm:$0xff] %vm1327_vm2, %v3009_v1  ;;  %3787 = vmatmul.mubr.msk.f32.vlgmr.msra.gmra.mrb[0].mxu0 (!%p3626_p10), %vm1327_vm2, %v3009_v1 }
 0xfa0   : > { %v3089_v28 = vpop.f32.mrb[0].mxu0 }
 0xfa1   : > { %v3090_v9 = vadd.f32 %v3089_v28, %v3019_v8  ;;  %v3788_v10 = vpop.f32.mrb[1].mxu0 }
 0xfa3   : > { %4063 = vtanh.f32 %v3090_v9 }
 0xfad   : > { %v4064_v11 = vpop.eup %4063 }
 0xfae   : > { %v3097_v12 = vsel %vm3096_vm10, %v4064_v11, 0.0 }
 0xfaf   : > { %3098 = vadd.xlane.f32.xlu0 %v3097_v12 }
0x103c   : > { %v3099_v13 = vpop.xlane.xlu0 %3098 }
0x103d   : > { %v3100_v14 = vmul.f32 0.03125, %v3099_v13 }
0x103f   : > { %v3101_v15 = vsub.f32 %v4064_v11, %v3100_v14 }
0x1041   : > { %v3102_v16 = vmul.f32 %v3101_v15, %v3101_v15 }
0x1043   : > { %v3103_v17 = vsel %vm3096_vm10, %v3102_v16, 0.0 }
0x1044   : > { %3104 = vadd.xlane.f32.xlu0 %v3103_v17 }
0x10d1   : > { %v3105_v24 = vpop.xlane.xlu0 %3104 }
0x10d2   : > { %v3106_v25 = vmul.f32 0.03125, %v3105_v24 }
0x10d4   : > { %v3107_v27 = vadd.f32 1e-05, %v3106_v25 }
0x10d6   : > { %4065 = vrsqrt.f32 %v3107_v27 }
0x10e0   : > { %v4066_v29 = vpop.eup %4065 }
0x10e1   : > { %v3109_v32 = vmul.f32 %v4066_v29, %v3101_v15 }
0x10e3   : > { %v3110_v37 = vmul.f32 %v3109_v32, %v3094_v30 }
0x10e5   : > { %v3111_v38 = vadd.f32 %v3110_v37, %v3095_v36 }
0x10e7   : > { %3798 = vmatmul.mubr.msk.f32.vlgmr.msra.gmra.mrb[0].mxu1 %vm1327_vm2, %v3111_v38 }
0x11ba   : > { %v3186_v39 = vpop.f32.mrb[0].mxu1 }
0x11bb   : > { %v3187_v41 = vadd.f32 %v3186_v39, %v3116_v45  ;;  %v3799_v42 = vpop.f32.mrb[1].mxu1 }
0x11bd   : > { %3191 = vst.msk [vmem:[%s1244_s4] sm:$0x1] %vm3190_vm11, %v3187_v41 }
0x11be PF: > { %s5954_s0 = sld [smem:[#allocation40_spill]]  ;;  %s5955_s5 = sld [smem:[#allocation76_spill]] }
0x11bf   : > { %s3205_s20 = sshll.u32 %s1244_s4, 4  ;;  %s3193_s25 = scalar_lea.sflag [#allocation5], %s5297_s1  ;;  %s3206_s20 = int_to_ptr.vmem [resolvable:$true] %s3205_s20 }
0x11c0   : > { %s4451_s29 = scalar_lea.vmem %s3206_s20, 16  ;;  %p5956_p3 = scmp.ne.s32.totalorder %s5895_s24, 0 }
0x11c1   : > { %p4452_p7 = scmp.ne.s32.totalorder %s3206_s20, %s4451_s29  ;;  %s4633_s16 = smov [#allocation24]  }
0x11c2   : > { %s4455_s7 = sshll.u32 %s4633_s16, 4  ;;  %s4456_s7 = int_to_ptr.vmem [resolvable:$false] %s4455_s7 }
0x11c3   : > { %p4453_p8 = pnand %p4452_p7, %p5956_p3  ;;  %s4457_s22 = scalar_lea.vmem %s4456_s7, 32 }
0x11c4   : > { %s3629_s3 = sshll.u32 %s5954_s0, 4  ;;  %p4458_p0 = scmp.lt.s32.totalorder %s3206_s20, %s4456_s7 }
0x11c5   : > { %s5692_s21 = scalar_lea.hbm %s5955_s5, %s3629_s3  ;;  %p4454_p9 = pneg %p4453_p8 }
0x11c6   : > { %p4459_p6 = scmp.lt.s32.totalorder %s4457_s22, %s4451_s29 }
0x11c8   : > { %p4460_p12 = por %p4459_p6, %p4458_p0 }
0x11ca   : > { %p4461_p2 = pnand %p4460_p12, %p4454_p9 }
0x11cc   : > { %4464 = shalt.err (!%p4461_p2)
}
0x11cd   : > { %s4465_s1 = scalar_lea.hbm %s5692_s21, 16  ;;  %s4469_s18 = scalar_lea.hbm %s5955_s5, 32 }
0x11ce   : > { %p4466_p11 = scmp.ne.s32.totalorder %s5692_s21, %s4465_s1  ;;  %p4470_p4 = scmp.lt.u32.totalorder %s5692_s21, %s5955_s5 }
0x11cf   : > { %p4471_p1 = scmp.lt.u32.totalorder %s4469_s18, %s4465_s1  ;;  %p4473_p7 = scmp.lt.u32.totalorder %s4465_s1, %s5692_s21 }
0x11d0   : > { %p4467_p5 = pnand %p4466_p11, %p5956_p3 }
0x11d1   : > { %p4472_p10 = por %p4471_p1, %p4470_p4 }
0x11d2   : > { %p4468_p13 = pneg %p4467_p5 }
0x11d3   : > { %p4474_p8 = por %p4473_p7, %p4472_p10 }
0x11d5   : > { %p4475_p9 = pnand %p4474_p8, %p4468_p13 }
0x11d7   : > { %4478 = shalt.err (!%p4475_p9)
}
0x11d8   : > { %3874 = dma.vmem_to_hbm [thread:$0]  (%p5956_p3), %s3206_s20, 16, %s5692_s21, %s3193_s25  }
0x11d9 PF: > { %s5957_s19 = sld [smem:[#allocation36_spill]]  ;;  %s5958_s14 = sld [smem:[#allocation49_spill]] }
0x11da   : > { %p3928_p0 = scmp.ge.s32.totalorder %s4601_s2, 2 }
0x11df   : > { %s3217_s27 = sand.u32 1, %s5957_s19   ;;  %p5959_p6 = scmp.ne.s32.totalorder %s5958_s14, 0 }
0x11e0   : > { %s3218_s11 = scalar_lea.sflag [#allocation5], %s3217_s27 }
0x11e1   : > { %p3918_p12 = pnand %p3928_p0, %p5959_p6 }
0x11e3   : > { %4556 = dma.done.wait (!%p3918_p12), %s3218_s11, 16  }
0x11e4   : > { %4558 = vsyncadd (!%p3918_p12), %s3218_s11, 4294967280  ;;  %s58_s2 = sadd.s32 1, %s4601_s2   ;;  %s5960_s27 = sld [smem:[#allocation34_spill]] }
0x11e5   : > { %p55_p2 = scmp.ge.s32.totalorder %s58_s2, 6   ;;  %s5961_s3 = sld [smem:[#allocation35_spill]] }
0x11e6   : > { %s5962_s7 = sld [smem:[#allocation47_spill]]  ;;  %s5963_s28 = sld [smem:[#allocation37_spill]] }
0x11e7   : > { %s5964_s8 = sld [smem:[#allocation38_spill]]  ;;  %s5965_s4 = sld [smem:[#allocation48_spill]] }
0x11e8   : > { %s5966_s29 = sld [smem:[#allocation41_spill]]  ;;  %s5967_s0 = sld [smem:[#allocation42_spill]] }
0x11e9   : > { %s5968_s9 = sld [smem:[#allocation45_spill]]  ;;  %s5969_s30 = sld [smem:[#allocation46_spill]] }
0x11ea   :  { %57 = sbr.rel (!%p55_p2) target bundleno = 48 (0x30), region = 319 }
0x11f1   :  { %3222 = vsyncpa [#allocation4], 1 }
0x11f2   :  { %3224 = vsyncpa [#allocation4 + $0x1], 1 }
0x11f3   :  { %3225 = vsyncpa [#allocation7], 1 }
0x11f4   :  { %3227 = vsyncpa [#allocation7 + $0x1], 1 }
0x11f5   :  { %3228 = vsyncpa [#allocation10], 1 }
0x11f6   :  { %3229 = vsyncpa [#allocation13], 1 }
0x11f7   :  { %3231 = vsyncpa [#allocation13 + $0x1], 1 }
0x11f8   :  { %3232 = vsyncpa [#allocation16], 1 }
0x11f9   :  { %3234 = vsyncpa [#allocation16 + $0x1], 1 }
0x11fa   :  { %3235 = vsyncpa [#allocation19], 1 }
0x11fb   :  { %3237 = vsyncpa [#allocation19 + $0x1], 1 }
0x11fc   :  { %3238 = vsyncpa [#allocation22], 1 }
0x11fd   :  { %3240 = vsyncpa [#allocation22 + $0x1], 1 }
0x11fe   :  { %3241 = vsyncpa [#allocation5], 1 }
0x11ff   :  { %3243 = vsyncpa [#allocation5 + $0x1], 1 }

</bundles_post_ra>
